<compile_context>
chip_gen: v6e
topology: v6e:2x2x1
jax: 0.10.0
libtpu: 0.0.40
codegen_flags: <defaults>
</compile_context>

<pallas_src>
import functools

import jax
import jax.numpy as jnp
from jax import lax
from jax.experimental import pallas as pl
from jax.experimental.pallas import tpu as pltpu


# ----------------------------------------------------------------------------- kernel
def _bottleneck_kernel(x_ref, w1_ref, w2_ref, w34_ref,
                       b1_ref, b2_ref, b34_ref,
                       out_ref, pad_ref, *, stride):
    """One batch element per grid step; every conv is a lane-dense 2-D matmul."""
    Hp, Wp, P = pad_ref.shape
    H, W = Hp - 2, Wp - 2
    Cin = x_ref.shape[-1]
    Ho = (H + 2 - 3) // stride + 1
    Wo = (W + 2 - 3) // stride + 1

    xm = x_ref[0]                                             # (H*W, Cin)  compute dtype

    # ---- conv1 (1x1, BN scale folded into w1) + bias + relu -------------------
    y1 = jnp.dot(xm, w1_ref[...], preferred_element_type=jnp.float32)
    y1 = jnp.maximum(y1 + b1_ref[...], 0.0)                   # (H*W, P) f32

    # ---- conv2 (3x3, pad=1, stride) as ONE im2col matmul ----------------------
    # Re-zero only the 1-px border each step (interior is fully overwritten).
    # Done per-step (not under pl.when(pid==0)) so it stays correct when the
    # batch axis is split across TensorCores (v7x megacore).
    zrow = jnp.zeros((1, Wp, P), jnp.float32)
    pad_ref[pl.ds(0, 1), :, :] = zrow
    pad_ref[pl.ds(H + 1, 1), :, :] = zrow
    zcol = jnp.zeros((H, 1, P), jnp.float32)
    pad_ref[pl.ds(1, H), pl.ds(0, 1), :] = zcol
    pad_ref[pl.ds(1, H), pl.ds(W + 1, 1), :] = zcol
    pad_ref[pl.ds(1, H), pl.ds(1, W), :] = y1.reshape(H, W, P)

    padded = pad_ref[...]                                     # (H+2, W+2, P) f32
    taps = []
    for dh in range(3):
        for dw in range(3):
            if stride == 1:                                   # static: no strided slice
                win = lax.slice(padded, (dh, dw, 0), (dh + Ho, dw + Wo, P))
            else:
                win = lax.slice(padded, (dh, dw, 0),
                                (dh + (Ho - 1) * stride + 1,
                                 dw + (Wo - 1) * stride + 1, P),
                                (stride, stride, 1))
            taps.append(win)                                  # (Ho, Wo, P)
    patches = jnp.concatenate(taps, axis=-1).reshape(Ho * Wo, 9 * P)
    y2 = jnp.dot(patches.astype(w2_ref.dtype), w2_ref[...],
                 preferred_element_type=jnp.float32)
    y2 = jnp.maximum(y2 + b2_ref[...], 0.0)                   # (Ho*Wo, P) f32

    # ---- fused conv3 + downsample (one matmul) + residual relu ----------------
    if stride == 1:
        xs = xm                                               # (H*W, Cin)
    else:
        xs = lax.slice(xm.reshape(H, W, Cin), (0, 0, 0),
                       ((Ho - 1) * stride + 1, (Wo - 1) * stride + 1, Cin),
                       (stride, stride, 1)).reshape(Ho * Wo, Cin)
    z = jnp.concatenate([y2.astype(w34_ref.dtype), xs.astype(w34_ref.dtype)],
                        axis=-1)                              # (Ho*Wo, P + Cin)
    y3 = jnp.dot(z, w34_ref[...], preferred_element_type=jnp.float32)
    out_ref[0] = jnp.maximum(y3 + b34_ref[...], 0.0).astype(out_ref.dtype)


# ----------------------------------------------------------------------------- wrapper
def _fold_bn(gamma, beta, mean, var, eps=1e-5):
    s = gamma / jnp.sqrt(var + eps)
    return s, beta - mean * s


def bottleneck_refinenet(x, params, stride=1, compute_dtype=jnp.bfloat16):
    N, H, W, Cin = x.shape
    w1, w2, w3, wd = params["w1"], params["w2"], params["w3"], params["wd"]
    P = w1.shape[1]
    Cout = w3.shape[1]
    Ho = (H + 2 - 3) // stride + 1
    Wo = (W + 2 - 3) // stride + 1

    s1, b1 = _fold_bn(*params["bn1"])
    s2, b2 = _fold_bn(*params["bn2"])
    s3, b3 = _fold_bn(*params["bn3"])
    sd, bd = _fold_bn(*params["bnd"])

    # Fold BN scales into the conv weights (free, wrapper-side JAX), pre-pack the
    # 3x3 weight into im2col (9P, P) layout, and fuse conv3 with the downsample.
    w1f = (w1 * s1[None, :]).astype(compute_dtype)                        # (Cin, P)
    w2f = (w2 * s2[None, None, None, :]).reshape(9 * P, P).astype(compute_dtype)
    w34 = jnp.concatenate([w3 * s3[None, :], wd * sd[None, :]],
                          axis=0).astype(compute_dtype)                   # (P+Cin, 2P)
    b1v = b1.reshape(1, P).astype(jnp.float32)
    b2v = b2.reshape(1, P).astype(jnp.float32)
    b34 = (b3 + bd).reshape(1, Cout).astype(jnp.float32)

    # Lane-dense 2-D activation slab; reshape is free wrapper-side plumbing.
    x2 = x.reshape(N, H * W, Cin).astype(compute_dtype)

    def full_spec(shape):
        return pl.BlockSpec(shape, lambda n, _nd=len(shape): (0,) * _nd)

    kernel = functools.partial(_bottleneck_kernel, stride=stride)

    out2 = pl.pallas_call(
        kernel,
        out_shape=jax.ShapeDtypeStruct((N, Ho * Wo, Cout), jnp.float32),
        grid=(N,),
        in_specs=[
            pl.BlockSpec((1, H * W, Cin), lambda n: (n, 0, 0)),
            full_spec(w1f.shape), full_spec(w2f.shape), full_spec(w34.shape),
            full_spec(b1v.shape), full_spec(b2v.shape), full_spec(b34.shape),
        ],
        out_specs=pl.BlockSpec((1, Ho * Wo, Cout), lambda n: (n, 0, 0)),
        scratch_shapes=[pltpu.VMEM((H + 2, W + 2, P), jnp.float32)],
        compiler_params=pltpu.CompilerParams(
            dimension_semantics=("parallel",),          # v7x: batch split over 2 TCs
            vmem_limit_bytes=32 * 1024 * 1024),          # raise v5e's 16 MiB default
    )(x2, w1f, w2f, w34, b1v, b2v, b34)

    return out2.reshape(N, Ho, Wo, Cout)


# ----------------------------------------------------------------------------- reference (plain JAX)
def reference(x, p, stride=1):
    def bn(y, g, b, m, v, eps=1e-5):
        return (y - m) / jnp.sqrt(v + eps) * g + b

    def conv(y, w, s, pad):
        return lax.conv_general_dilated(
            y, w, (s, s), pad, dimension_numbers=("NHWC", "HWIO", "NHWC"))

    out = conv(x, p["w1"][None, None], 1, "VALID")
    out = jax.nn.relu(bn(out, *p["bn1"]))
    out = conv(out, p["w2"], stride, [(1, 1), (1, 1)])
    out = jax.nn.relu(bn(out, *p["bn2"]))
    out = conv(out, p["w3"][None, None], 1, "VALID")
    out = bn(out, *p["bn3"])
    res = conv(x, p["wd"][None, None], stride, "VALID")
    res = bn(res, *p["bnd"])
    return jax.nn.relu(out + res)


# ----------------------------------------------------------------------------- main
if __name__ == "__main__":
    key = jax.random.PRNGKey(0)
    ks = jax.random.split(key, 16)

    N, H, W = 2, 16, 16
    inplanes, planes, stride = 8, 4, 1
    out_planes = planes * 2  # module uses planes * 2 for conv3 / downsample

    def bn_params(k, c):
        k1, k2, k3, k4 = jax.random.split(k, 4)
        gamma = 1.0 + 0.1 * jax.random.normal(k1, (c,), jnp.float32)
        beta = 0.1 * jax.random.normal(k2, (c,), jnp.float32)
        mean = 0.1 * jax.random.normal(k3, (c,), jnp.float32)
        var = 0.5 + jax.random.uniform(k4, (c,), jnp.float32)
        return (gamma, beta, mean, var)

    params = {
        "w1": 0.1 * jax.random.normal(ks[0], (inplanes, planes), jnp.float32),
        "w2": 0.1 * jax.random.normal(ks[1], (3, 3, planes, planes), jnp.float32),
        "w3": 0.1 * jax.random.normal(ks[2], (planes, out_planes), jnp.float32),
        "wd": 0.1 * jax.random.normal(ks[3], (inplanes, out_planes), jnp.float32),
        "bn1": bn_params(ks[4], planes),
        "bn2": bn_params(ks[5], planes),
        "bn3": bn_params(ks[6], out_planes),
        "bnd": bn_params(ks[7], out_planes),
    }

    # NHWC input (equivalent to PyTorch NCHW (2, 8, 16, 16))
    x = jax.random.normal(ks[8], (N, H, W, inplanes), jnp.float32)

    ref = reference(x, params, stride=stride)

    # Production path: bf16 matmuls, f32 accumulation.
    out = jax.block_until_ready(bottleneck_refinenet(x, params, stride=stride))
    assert out.shape == ref.shape, (out.shape, ref.shape)
    assert jnp.allclose(out, ref, atol=3e-2, rtol=3e-2), \
        float(jnp.max(jnp.abs(out - ref)))

    # f32 path: validates the kernel math at tight tolerance.
    out32 = jax.block_until_ready(
        bottleneck_refinenet(x, params, stride=stride, compute_dtype=jnp.float32))
    assert jnp.allclose(out32, ref, atol=1e-4, rtol=1e-4), \
        float(jnp.max(jnp.abs(out32 - ref)))

    print("KERNEL_OK")
</pallas_src>

<mosaic_0001>
module attributes {stable_mosaic.version = 11 : i64} {
  func.func @_bottleneck_kernel(%arg0: i32, %arg1: memref<1x256x8xbf16, #tpu.memory_space<vmem>>, %arg2: memref<8x4xbf16, #tpu.memory_space<vmem>>, %arg3: memref<36x4xbf16, #tpu.memory_space<vmem>>, %arg4: memref<12x8xbf16, #tpu.memory_space<vmem>>, %arg5: memref<1x4xf32, #tpu.memory_space<vmem>>, %arg6: memref<1x4xf32, #tpu.memory_space<vmem>>, %arg7: memref<1x8xf32, #tpu.memory_space<vmem>>, %arg8: memref<1x256x8xf32, #tpu.memory_space<vmem>>, %arg9: memref<18x18x4xf32, #tpu.memory_space<vmem>>) attributes {dimension_semantics = [#tpu.dimension_semantics<parallel>], iteration_bounds = array<i64: 2>, scalar_prefetch = 0 : i64, scratch_operands = 1 : i64, tpu.core_type = #tpu.core_type<tc>, window_params = [{transform_indices = @transform_0, window_bounds = array<i64: 1, 256, 8>}, {pipeline_mode = #tpu.pipeline_mode<synchronous>, transform_indices = @transform_1, window_bounds = array<i64: 8, 4>}, {pipeline_mode = #tpu.pipeline_mode<synchronous>, transform_indices = @transform_2, window_bounds = array<i64: 36, 4>}, {pipeline_mode = #tpu.pipeline_mode<synchronous>, transform_indices = @transform_3, window_bounds = array<i64: 12, 8>}, {pipeline_mode = #tpu.pipeline_mode<synchronous>, transform_indices = @transform_4, window_bounds = array<i64: 1, 4>}, {pipeline_mode = #tpu.pipeline_mode<synchronous>, transform_indices = @transform_5, window_bounds = array<i64: 1, 4>}, {pipeline_mode = #tpu.pipeline_mode<synchronous>, transform_indices = @transform_6, window_bounds = array<i64: 1, 8>}, {transform_indices = @transform_7, window_bounds = array<i64: 1, 256, 8>}]} {
    %c0 = arith.constant 0 : index
    %c0_0 = arith.constant 0 : index
    %c0_1 = arith.constant 0 : index
    %0 = vector.load %arg1[%c0, %c0_0, %c0_1] : memref<1x256x8xbf16, #tpu.memory_space<vmem>>, vector<1x256x8xbf16>
    %1 = vector.shape_cast %0 : vector<1x256x8xbf16> to vector<256x8xbf16>
    %c0_2 = arith.constant 0 : index
    %c0_3 = arith.constant 0 : index
    %2 = vector.load %arg2[%c0_2, %c0_3] : memref<8x4xbf16, #tpu.memory_space<vmem>>, vector<8x4xbf16>
    %cst = arith.constant dense<0.000000e+00> : vector<256x4xf32>
    %3 = tpu.matmul %1, %2, %cst {dimension_numbers = #tpu.dot_dimension_numbers<[1], [0], [0], [1], [0, 0, 1, 1], [], []>} : vector<256x8xbf16>, vector<8x4xbf16>, vector<256x4xf32> -> vector<256x4xf32>
    %c0_4 = arith.constant 0 : index
    %c0_5 = arith.constant 0 : index
    %4 = vector.load %arg5[%c0_4, %c0_5] : memref<1x4xf32, #tpu.memory_space<vmem>>, vector<1x4xf32>
    %5 = vector.broadcast %4 : vector<1x4xf32> to vector<256x4xf32>
    %6 = arith.addf %3, %5 : vector<256x4xf32>
    %cst_6 = arith.constant 0.000000e+00 : f32
    %7 = vector.broadcast %cst_6 : f32 to vector<256x4xf32>
    %8 = arith.maximumf %6, %7 : vector<256x4xf32>
    %cst_7 = arith.constant 0.000000e+00 : f32
    %9 = vector.broadcast %cst_7 : f32 to vector<1x18x4xf32>
    %c0_8 = arith.constant 0 : index
    %c0_9 = arith.constant 0 : index
    %c0_10 = arith.constant 0 : index
    %10 = vector.load %arg9[%c0_8, %c0_9, %c0_10] : memref<18x18x4xf32, #tpu.memory_space<vmem>>, vector<1x18x4xf32>
    tpu.vector_store %arg9[%c0_8, %c0_9, %c0_10], %9 {strides = array<i32>} : memref<18x18x4xf32, #tpu.memory_space<vmem>>, vector<1x18x4xf32>,
    %c17 = arith.constant 17 : index
    %c0_11 = arith.constant 0 : index
    %c0_12 = arith.constant 0 : index
    %11 = vector.load %arg9[%c17, %c0_11, %c0_12] : memref<18x18x4xf32, #tpu.memory_space<vmem>>, vector<1x18x4xf32>
    tpu.vector_store %arg9[%c17, %c0_11, %c0_12], %9 {strides = array<i32>} : memref<18x18x4xf32, #tpu.memory_space<vmem>>, vector<1x18x4xf32>,
    %cst_13 = arith.constant 0.000000e+00 : f32
    %12 = vector.broadcast %cst_13 : f32 to vector<16x1x4xf32>
    %c1 = arith.constant 1 : index
    %c0_14 = arith.constant 0 : index
    %c0_15 = arith.constant 0 : index
    %13 = vector.load %arg9[%c1, %c0_14, %c0_15] : memref<18x18x4xf32, #tpu.memory_space<vmem>>, vector<16x1x4xf32>
    tpu.vector_store %arg9[%c1, %c0_14, %c0_15], %12 {strides = array<i32>} : memref<18x18x4xf32, #tpu.memory_space<vmem>>, vector<16x1x4xf32>,
    %c1_16 = arith.constant 1 : index
    %c17_17 = arith.constant 17 : index
    %c0_18 = arith.constant 0 : index
    %14 = vector.load %arg9[%c1_16, %c17_17, %c0_18] : memref<18x18x4xf32, #tpu.memory_space<vmem>>, vector<16x1x4xf32>
    tpu.vector_store %arg9[%c1_16, %c17_17, %c0_18], %12 {strides = array<i32>} : memref<18x18x4xf32, #tpu.memory_space<vmem>>, vector<16x1x4xf32>,
    %15 = vector.shape_cast %8 : vector<256x4xf32> to vector<16x16x4xf32>
    %c1_19 = arith.constant 1 : index
    %c1_20 = arith.constant 1 : index
    %c0_21 = arith.constant 0 : index
    %16 = vector.load %arg9[%c1_19, %c1_20, %c0_21] : memref<18x18x4xf32, #tpu.memory_space<vmem>>, vector<16x16x4xf32>
    tpu.vector_store %arg9[%c1_19, %c1_20, %c0_21], %15 {strides = array<i32>} : memref<18x18x4xf32, #tpu.memory_space<vmem>>, vector<16x16x4xf32>,
    %c0_22 = arith.constant 0 : index
    %c0_23 = arith.constant 0 : index
    %c0_24 = arith.constant 0 : index
    %17 = vector.load %arg9[%c0_22, %c0_23, %c0_24] : memref<18x18x4xf32, #tpu.memory_space<vmem>>, vector<18x18x4xf32>
    %18 = vector.extract_strided_slice %17 {offsets = [0, 0, 0], sizes = [16, 16, 4], strides = [1, 1, 1]} : vector<18x18x4xf32> to vector<16x16x4xf32>
    %19 = vector.extract_strided_slice %17 {offsets = [0, 1, 0], sizes = [16, 16, 4], strides = [1, 1, 1]} : vector<18x18x4xf32> to vector<16x16x4xf32>
    %20 = vector.extract_strided_slice %17 {offsets = [0, 2, 0], sizes = [16, 16, 4], strides = [1, 1, 1]} : vector<18x18x4xf32> to vector<16x16x4xf32>
    %21 = vector.extract_strided_slice %17 {offsets = [1, 0, 0], sizes = [16, 16, 4], strides = [1, 1, 1]} : vector<18x18x4xf32> to vector<16x16x4xf32>
    %22 = vector.extract_strided_slice %17 {offsets = [1, 1, 0], sizes = [16, 16, 4], strides = [1, 1, 1]} : vector<18x18x4xf32> to vector<16x16x4xf32>
    %23 = vector.extract_strided_slice %17 {offsets = [1, 2, 0], sizes = [16, 16, 4], strides = [1, 1, 1]} : vector<18x18x4xf32> to vector<16x16x4xf32>
    %24 = vector.extract_strided_slice %17 {offsets = [2, 0, 0], sizes = [16, 16, 4], strides = [1, 1, 1]} : vector<18x18x4xf32> to vector<16x16x4xf32>
    %25 = vector.extract_strided_slice %17 {offsets = [2, 1, 0], sizes = [16, 16, 4], strides = [1, 1, 1]} : vector<18x18x4xf32> to vector<16x16x4xf32>
    %26 = vector.extract_strided_slice %17 {offsets = [2, 2, 0], sizes = [16, 16, 4], strides = [1, 1, 1]} : vector<18x18x4xf32> to vector<16x16x4xf32>
    %27 = tpu.concatenate %18, %19, %20, %21, %22, %23, %24, %25, %26 in 2 : vector<16x16x4xf32>, vector<16x16x4xf32>, vector<16x16x4xf32>, vector<16x16x4xf32>, vector<16x16x4xf32>, vector<16x16x4xf32>, vector<16x16x4xf32>, vector<16x16x4xf32>, vector<16x16x4xf32> -> vector<16x16x36xf32>
    %28 = vector.shape_cast %27 : vector<16x16x36xf32> to vector<256x36xf32>
    %29 = arith.truncf %28 : vector<256x36xf32> to vector<256x36xbf16>
    %c0_25 = arith.constant 0 : index
    %c0_26 = arith.constant 0 : index
    %30 = vector.load %arg3[%c0_25, %c0_26] : memref<36x4xbf16, #tpu.memory_space<vmem>>, vector<36x4xbf16>
    %cst_27 = arith.constant dense<0.000000e+00> : vector<256x4xf32>
    %31 = tpu.matmul %29, %30, %cst_27 {dimension_numbers = #tpu.dot_dimension_numbers<[1], [0], [0], [1], [0, 0, 1, 1], [], []>} : vector<256x36xbf16>, vector<36x4xbf16>, vector<256x4xf32> -> vector<256x4xf32>
    %c0_28 = arith.constant 0 : index
    %c0_29 = arith.constant 0 : index
    %32 = vector.load %arg6[%c0_28, %c0_29] : memref<1x4xf32, #tpu.memory_space<vmem>>, vector<1x4xf32>
    %33 = vector.broadcast %32 : vector<1x4xf32> to vector<256x4xf32>
    %34 = arith.addf %31, %33 : vector<256x4xf32>
    %cst_30 = arith.constant 0.000000e+00 : f32
    %35 = vector.broadcast %cst_30 : f32 to vector<256x4xf32>
    %36 = arith.maximumf %34, %35 : vector<256x4xf32>
    %37 = arith.truncf %36 : vector<256x4xf32> to vector<256x4xbf16>
    %38 = tpu.concatenate %37, %1 in 1 : vector<256x4xbf16>, vector<256x8xbf16> -> vector<256x12xbf16>
    %c0_31 = arith.constant 0 : index
    %c0_32 = arith.constant 0 : index
    %39 = vector.load %arg4[%c0_31, %c0_32] : memref<12x8xbf16, #tpu.memory_space<vmem>>, vector<12x8xbf16>
    %cst_33 = arith.constant dense<0.000000e+00> : vector<256x8xf32>
    %40 = tpu.matmul %38, %39, %cst_33 {dimension_numbers = #tpu.dot_dimension_numbers<[1], [0], [0], [1], [0, 0, 1, 1], [], []>} : vector<256x12xbf16>, vector<12x8xbf16>, vector<256x8xf32> -> vector<256x8xf32>
    %c0_34 = arith.constant 0 : index
    %c0_35 = arith.constant 0 : index
    %41 = vector.load %arg7[%c0_34, %c0_35] : memref<1x8xf32, #tpu.memory_space<vmem>>, vector<1x8xf32>
    %42 = vector.broadcast %41 : vector<1x8xf32> to vector<256x8xf32>
    %43 = arith.addf %40, %42 : vector<256x8xf32>
    %cst_36 = arith.constant 0.000000e+00 : f32
    %44 = vector.broadcast %cst_36 : f32 to vector<256x8xf32>
    %45 = arith.maximumf %43, %44 : vector<256x8xf32>
    %c0_37 = arith.constant 0 : index
    %c0_38 = arith.constant 0 : index
    %c0_39 = arith.constant 0 : index
    %46 = vector.load %arg8[%c0_37, %c0_38, %c0_39] : memref<1x256x8xf32, #tpu.memory_space<vmem>>, vector<1x256x8xf32>
    %47 = vector.shape_cast %46 : vector<1x256x8xf32> to vector<256x8xf32>
    %48 = vector.shape_cast %45 : vector<256x8xf32> to vector<1x256x8xf32>
    tpu.vector_store %arg8[%c0_37, %c0_38, %c0_39], %48 {strides = array<i32>} : memref<1x256x8xf32, #tpu.memory_space<vmem>>, vector<1x256x8xf32>,
    return
  }
  func.func @transform_0(%arg0: i32) -> (i32, i32, i32) {
    %c0_i32 = arith.constant 0 : i32
    %c0_i32_0 = arith.constant 0 : i32
    %c0_i32_1 = arith.constant 0 : i32
    return %arg0, %c0_i32, %c0_i32_0 : i32, i32, i32
  }
  func.func @transform_1(%arg0: i32) -> (i32, i32) {
    %c0_i32 = arith.constant 0 : i32
    %c0_i32_0 = arith.constant 0 : i32
    %c0_i32_1 = arith.constant 0 : i32
    return %c0_i32, %c0_i32_0 : i32, i32
  }
  func.func @transform_2(%arg0: i32) -> (i32, i32) {
    %c0_i32 = arith.constant 0 : i32
    %c0_i32_0 = arith.constant 0 : i32
    %c0_i32_1 = arith.constant 0 : i32
    return %c0_i32, %c0_i32_0 : i32, i32
  }
  func.func @transform_3(%arg0: i32) -> (i32, i32) {
    %c0_i32 = arith.constant 0 : i32
    %c0_i32_0 = arith.constant 0 : i32
    %c0_i32_1 = arith.constant 0 : i32
    return %c0_i32, %c0_i32_0 : i32, i32
  }
  func.func @transform_4(%arg0: i32) -> (i32, i32) {
    %c0_i32 = arith.constant 0 : i32
    %c0_i32_0 = arith.constant 0 : i32
    %c0_i32_1 = arith.constant 0 : i32
    return %c0_i32, %c0_i32_0 : i32, i32
  }
  func.func @transform_5(%arg0: i32) -> (i32, i32) {
    %c0_i32 = arith.constant 0 : i32
    %c0_i32_0 = arith.constant 0 : i32
    %c0_i32_1 = arith.constant 0 : i32
    return %c0_i32, %c0_i32_0 : i32, i32
  }
  func.func @transform_6(%arg0: i32) -> (i32, i32) {
    %c0_i32 = arith.constant 0 : i32
    %c0_i32_0 = arith.constant 0 : i32
    %c0_i32_1 = arith.constant 0 : i32
    return %c0_i32, %c0_i32_0 : i32, i32
  }
  func.func @transform_7(%arg0: i32) -> (i32, i32, i32) {
    %c0_i32 = arith.constant 0 : i32
    %c0_i32_0 = arith.constant 0 : i32
    %c0_i32_1 = arith.constant 0 : i32
    return %arg0, %c0_i32, %c0_i32_0 : i32, i32, i32
  }
}

</mosaic_0001>

<bundles_post_ra>
// kernel: tpu_custom_call.1
= control target key start
LH: loop header
LB: loop body
LE: loop exit
PB: predicated region body
PF: predicated region fallthrough
CT: control target
= control target key end

     0   :  { %s3782_s24 = smov 0   ;;  %s5255_s0 = inlined_call_operand.vmem [shape: bf16[2,256,8], index: 0, kind: input, shape index: {}]   ;;  %s5256_s1 = inlined_call_operand.vmem [shape: bf16[8,4], index: 1, kind: input, shape index: {}]   ;;  %s5257_s2 = inlined_call_operand.vmem [shape: bf16[36,4], index: 2, kind: input, shape index: {}]   ;;  %s5258_s3 = inlined_call_operand.vmem [shape: bf16[12,8], index: 3, kind: input, shape index: {}]   ;;  %s5259_s4 = inlined_call_operand.vmem [shape: f32[1,4], index: 4, kind: input, shape index: {}]   ;;  %s5260_s5 = inlined_call_operand.vmem [shape: f32[1,4], index: 5, kind: input, shape index: {}]   ;;  %s5261_s6 = inlined_call_operand.vmem [shape: f32[1,8], index: 6, kind: input, shape index: {}]   ;;  %s5262_s7 = inlined_call_operand.vmem [shape: f32[2,256,8], index: 7, kind: output, shape index: {}]  }
   0x1 LB: > { %s2755_s25 = sadd.s32 4294967295, %s3731_s24   ;;  %p2759_p0 = scmp.ge.s32.totalorder %s3731_s24, 1  ;;  %s3731_s24 = sphi %s3782_s24, %s17_s24  }
   0x2   : > { %p237_p1 = scmp.lt.s32.totalorder %s3731_s24, 3 }
   0x4   : > { %p238_p2 = pnand %p2759_p0, %p237_p1 }
   0x6   : > { %241 = sbr.rel (%p238_p2) target bundleno = 1010 (0x3f2), region = 48 }
   0xb   : > { %v312_v0 = vld [vmem:[%s5256_s1] sm:$0xf]  ;;  %vm449_vm0 = vcmask 1043456   ;;  %p269_p3 = scmp.lt.s32.totalorder %s2755_s25, 1  ;;  %vm400_vm1 = vcmask 64512   ;;  %vm646_vm2 = vcmask 31744  }
   0xc   : > { %3000 = vmatprep.subr.msk.bf16.mxu0 %vm449_vm0, %v312_v0  ;;  %3001 = vmatprep.subr.msk.bf16.mxu1 %vm449_vm0, %v312_v0  ;;  %v451_v1 = vsel %vm449_vm0, %v312_v0, 0  ;;  %vm649_vm3 = vcmask 25600   ;;  %v3733_v18 = vmov 0.0   ;;  %vm656_vm4 = vcmask 24576   ;;  %s3734_s9 = smov 8   ;;  %s3735_s10 = smov 4  }
   0xd   : > { %2893 = vmatpush3.bf16.msra.mxu0 %v451_v1  ;;  %2999 = vmatpush3.bf16.msra.mxu1 %v451_v1  ;;  %s5319_s25 = smov (!%p269_p3, %s2755_s25), 1  ;;  %647 = vst.msk [vmem:[#allocation2] sm:$0xff] %vm646_vm2, %v3733_v18  ;;  %648 = vst.msk [vmem:[#allocation2 + $0x8] sm:$0xff] %vm646_vm2, %v3733_v18  ;;  %vm1000_vm5 = vcmask 1045504   ;;  %vm823_vm6 = vcmask 1046528   ;;  %s3736_s13 = smov 24  }
   0xe   : > { %s2837_s28 = sshll.u32 %s5319_s25, 7  ;;  %650 = vst.msk [vmem:[#allocation2 + $0x10] sm:$0x3] %vm649_vm3, %v3733_v18  ;;  %654 = vst.msk [vmem:[#allocation2 + $0x1a8] sm:$0x3] %vm649_vm3, %v3733_v18  ;;  %s3737_s14 = smov 12  }
   0xf   : > { %s3799_s8 = scalar_lea.vmem %s5255_s0, %s2837_s28  ;;  %652 = vst.msk [vmem:[#allocation2 + $0x198] sm:$0xff] %vm646_vm2, %v3733_v18  ;;  %653 = vst.msk [vmem:[#allocation2 + $0x1a0] sm:$0xff] %vm646_vm2, %v3733_v18  ;;  %v3886_v34 = vld [vmem:[%s5259_s4] ss:$0 sm:$0xff]  ;;  %s3738_s15 = smov 16   ;;  %vm2133_vm7 = vcmask 1041408  }
  0x10   : > { %v3661_v2 = vld [vmem:[%s3799_s8] sm:$0xff]   ;;  %v3663_v4 = vld [vmem:[%s3799_s8 + $0x8] sm:$0xff]   ;;  %v3665_v6 = vld [vmem:[%s3799_s8 + $0x10] sm:$0xff]   ;;  %658 = vst.msk [vmem:[#allocation2 + $0x30] sm:$0x1] %vm656_vm4, %v3733_v18  ;;  %s3739_s16 = smov 20  }
  0x11   : > { %v3662_v3 = vld [vmem:[%s3799_s8 + $0x40] sm:$0xff]   ;;  %2894 = vmatprep.mubr.msk.bf16.mxu0 %vm400_vm1, %v3661_v2  ;;  %v3664_v5 = vld [vmem:[%s3799_s8 + $0x48] sm:$0xff]   ;;  %v3667_v7 = vld [vmem:[%s3799_s8 + $0x50] sm:$0xff]   ;;  %657 = vst.msk [vmem:[#allocation2 + $0x18] sm:$0x1] %vm656_vm4, %v3733_v18  ;;  %s3740_s17 = smov 28  }
  0x12   : > { %2910 = vmatprep.mubr.msk.bf16.mxu1 %vm400_vm1, %v3662_v3  ;;  %2895 = vmatmul.mubr.msk.bf16.vlgmr.msra.gmra.mxu0 %vm400_vm1, %v3663_v4  ;;  %v3666_v8 = vld [vmem:[%s3799_s8 + $0x18] sm:$0xff]   ;;  %v3669_v10 = vld [vmem:[%s3799_s8 + $0x20] sm:$0xff]   ;;  %v3670_v12 = vld [vmem:[%s3799_s8 + $0x28] sm:$0xff]   ;;  %659 = vst.msk [vmem:[#allocation2 + $0x48] sm:$0x1] %vm656_vm4, %v3733_v18  ;;  %s3741_s18 = smov 32  }
  0x13   : > { %2911 = vmatmul.mubr.msk.bf16.vlgmr.msra.gmra.mxu1 %vm400_vm1, %v3664_v5  ;;  %2898 = vmatprep.mubr.msk.bf16.mxu0 %vm400_vm1, %v3665_v6  ;;  %v3668_v9 = vld [vmem:[%s3799_s8 + $0x58] sm:$0xff]   ;;  %v3671_v11 = vld [vmem:[%s3799_s8 + $0x60] sm:$0xff]   ;;  %v3672_v13 = vld [vmem:[%s3799_s8 + $0x68] sm:$0xff]   ;;  %660 = vst.msk [vmem:[#allocation2 + $0x60] sm:$0x1] %vm656_vm4, %v3733_v18  ;;  %vm1843_vm8 = vcmask 97280  }
  0x14   : > { %2914 = vmatprep.mubr.msk.bf16.mxu1 %vm400_vm1, %v3667_v7  ;;  %v3673_v14 = vld [vmem:[%s3799_s8 + $0x30] sm:$0xff]   ;;  %v3674_v16 = vld [vmem:[%s3799_s8 + $0x38] sm:$0xff]   ;;  %661 = vst.msk [vmem:[#allocation2 + $0x78] sm:$0x1] %vm656_vm4, %v3733_v18  ;;  %662 = vst.msk [vmem:[#allocation2 + $0x90] sm:$0x1] %vm656_vm4, %v3733_v18 }
  0x15   : > { %v3675_v15 = vld [vmem:[%s3799_s8 + $0x70] sm:$0xff]   ;;  %v3676_v17 = vld [vmem:[%s3799_s8 + $0x78] sm:$0xff]   ;;  %663 = vst.msk [vmem:[#allocation2 + $0xa8] sm:$0x1] %vm656_vm4, %v3733_v18  ;;  %664 = vst.msk [vmem:[#allocation2 + $0xc0] sm:$0x1] %vm656_vm4, %v3733_v18 }
  0x16   : > { %665 = vst.msk [vmem:[#allocation2 + $0xd8] sm:$0x1] %vm656_vm4, %v3733_v18  ;;  %666 = vst.msk [vmem:[#allocation2 + $0xf0] sm:$0x1] %vm656_vm4, %v3733_v18  ;;  %v3869_v19 = vld [vmem:[#allocation2] sm:$0xff]  ;;  %v3871_v20 = vld [vmem:[#allocation2 + $0x8] sm:$0xff] }
  0x17   : > { %667 = vst.msk [vmem:[#allocation2 + $0x108] sm:$0x1] %vm656_vm4, %v3733_v18  ;;  %668 = vst.msk [vmem:[#allocation2 + $0x120] sm:$0x1] %vm656_vm4, %v3733_v18  ;;  %v723_v21 = vld [vmem:[#allocation2 + $0x10] sm:$0x3] }
  0x18   : > { %669 = vst.msk [vmem:[#allocation2 + $0x138] sm:$0x1] %vm656_vm4, %v3733_v18  ;;  %670 = vst.msk [vmem:[#allocation2 + $0x150] sm:$0x1] %vm656_vm4, %v3733_v18  ;;  %v1001_v22 = vrot.slane %v3869_v19, 2  ;;  %v1002_v23 = vrot.slane %v3871_v20, 2 }
  0x19   : > { %671 = vst.msk [vmem:[#allocation2 + $0x168] sm:$0x1] %vm656_vm4, %v3733_v18  ;;  %672 = vst.msk [vmem:[#allocation2 + $0x180] sm:$0x1] %vm656_vm4, %v3733_v18  ;;  %v1004_v24 = vrot.slane %v723_v21, 2  ;;  %v824_v25 = vrot.slane %v3869_v19, 1 }
  0x1a   : > { %2899 = vmatmul.mubr.msk.bf16.gmra.mxu0 %vm400_vm1, %v3666_v8  ;;  %673 = vst.msk [vmem:[#allocation2 + $0x29] sm:$0x1] %vm656_vm4, %v3733_v18  ;;  %674 = vst.msk [vmem:[#allocation2 + $0x41] sm:$0x1] %vm656_vm4, %v3733_v18  ;;  %v825_v26 = vrot.slane %v3871_v20, 1  ;;  %v827_v27 = vrot.slane %v723_v21, 1  ;;  %v1003_v28 = vsel %vm1000_vm5, %v1001_v22, %v1002_v23 }
  0x1b   : > { %2915 = vmatmul.mubr.msk.bf16.gmra.mxu1 %vm400_vm1, %v3668_v9  ;;  %2902 = vmatprep.mubr.msk.bf16.mxu0 %vm400_vm1, %v3669_v10  ;;  %675 = vst.msk [vmem:[#allocation2 + $0x59] sm:$0x1] %vm656_vm4, %v3733_v18  ;;  %676 = vst.msk [vmem:[#allocation2 + $0x71] sm:$0x1] %vm656_vm4, %v3733_v18  ;;  %v1005_v29 = vsel %vm1000_vm5, %v1002_v23, %v1004_v24  ;;  %vm1876_vm9 = vcmask 130048   ;;  %vm1909_vm10 = vcmask 162816  }
  0x1c   : > { %2918 = vmatprep.mubr.msk.bf16.mxu1 %vm400_vm1, %v3671_v11  ;;  %677 = vst.msk [vmem:[#allocation2 + $0x89] sm:$0x1] %vm656_vm4, %v3733_v18  ;;  %678 = vst.msk [vmem:[#allocation2 + $0xa1] sm:$0x1] %vm656_vm4, %v3733_v18  ;;  %v3026_v30 = vpack.i.bf16 %v1005_v29, %v1003_v28  ;;  %v826_v31 = vsel %vm823_vm6, %v824_v25, %v825_v26  ;;  %v828_v32 = vsel %vm823_vm6, %v825_v26, %v827_v27  ;;  %vm1942_vm11 = vcmask 195584  }
  0x1d   : > { %679 = vst.msk [vmem:[#allocation2 + $0xb9] sm:$0x1] %vm656_vm4, %v3733_v18  ;;  %680 = vst.msk [vmem:[#allocation2 + $0xd1] sm:$0x1] %vm656_vm4, %v3733_v18  ;;  %v3021_v33 = vpack.i.bf16 %v828_v32, %v826_v31  ;;  %vm1975_vm12 = vcmask 228352   ;;  %vm2008_vm13 = vcmask 261120  }
  0x1e   : > { %681 = vst.msk [vmem:[#allocation2 + $0xe9] sm:$0x1] %vm656_vm4, %v3733_v18  ;;  %682 = vst.msk [vmem:[#allocation2 + $0x101] sm:$0x1] %vm656_vm4, %v3733_v18  ;;  %3027 = vrot.lane.b32.xlu1 %v3026_v30, %s3734_s9  ;;  %vm2084_vm14 = vcmask 293888  }
  0x1f   : > { %683 = vst.msk [vmem:[#allocation2 + $0x119] sm:$0x1] %vm656_vm4, %v3733_v18  ;;  %684 = vst.msk [vmem:[#allocation2 + $0x131] sm:$0x1] %vm656_vm4, %v3733_v18  ;;  %3022 = vrot.lane.b32.xlu0 %v3021_v33, %s3735_s10 }
  0x20   : > { %685 = vst.msk [vmem:[#allocation2 + $0x149] sm:$0x1] %vm656_vm4, %v3733_v18  ;;  %686 = vst.msk [vmem:[#allocation2 + $0x161] sm:$0x1] %vm656_vm4, %v3733_v18 }
  0x21   : > { %687 = vst.msk [vmem:[#allocation2 + $0x179] sm:$0x1] %vm656_vm4, %v3733_v18  ;;  %688 = vst.msk [vmem:[#allocation2 + $0x191] sm:$0x1] %vm656_vm4, %v3733_v18 }
  0x22   : > { %2903 = vmatmul.mubr.msk.bf16.gmra.mxu0 %vm400_vm1, %v3670_v12 }
  0x23   : > { %2919 = vmatmul.mubr.msk.bf16.gmra.mxu1 %vm400_vm1, %v3672_v13  ;;  %2906 = vmatprep.mubr.msk.bf16.mxu0 %vm400_vm1, %v3673_v14 }
  0x24   : > { %2922 = vmatprep.mubr.msk.bf16.mxu1 %vm400_vm1, %v3675_v15 }
  0x2a   : > { %2907 = vmatmul.mubr.msk.bf16.gmra.mxu0 %vm400_vm1, %v3674_v16 }
  0x2b   : > { %2923 = vmatmul.mubr.msk.bf16.gmra.mxu1 %vm400_vm1, %v3676_v17 }
  0xd2   : > { %v2896_v35 = vpop.f32.mrf.mxu0 }
  0xd3   : > { %v496_v36 = vadd.f32 %v2896_v35, %v3886_v34  ;;  %v2912_v37 = vpop.f32.mrf.mxu1 }
  0xd4   : > { %v560_v38 = vadd.f32 %v2912_v37, %v3886_v34  ;;  %v487_v39 = vpop.f32.mrf.mxu0 }
  0xd5   : > { %v616_v40 = vmax.f32 %v496_v36, 0.0  ;;  %v488_v41 = vadd.f32 %v3886_v34, %v487_v39  ;;  %v551_v42 = vpop.f32.mrf.mxu1 }
  0xd6   : > { %v632_v43 = vmax.f32 %v560_v38, 0.0  ;;  %v552_v44 = vadd.f32 %v3886_v34, %v551_v42  ;;  %v2897_v45 = vpop.f32.mrf.mxu0 }
  0xd7   : > { %691 = vst.msk [vmem:[#allocation2 + $0x31] sm:$0xff] %vm646_vm2, %v616_v40  ;;  %v614_v46 = vmax.f32 %v488_v41, 0.0  ;;  %v499_v47 = vadd.f32 %v2897_v45, %v3886_v34  ;;  %v2913_v48 = vpop.f32.mrf.mxu1 }
  0xd8   : > { %707 = vst.msk [vmem:[#allocation2 + $0xf1] sm:$0xff] %vm646_vm2, %v632_v43  ;;  %v630_v49 = vmax.f32 %v552_v44, 0.0  ;;  %v563_v50 = vadd.f32 %v2913_v48, %v3886_v34  ;;  %v490_v51 = vpop.f32.mrf.mxu0 }
  0xd9   : > { %689 = vst.msk [vmem:[#allocation2 + $0x19] sm:$0xff] %vm646_vm2, %v614_v46  ;;  %v617_v52 = vmax.f32 %v499_v47, 0.0  ;;  %v491_v53 = vadd.f32 %v3886_v34, %v490_v51  ;;  %v554_v54 = vpop.f32.mrf.mxu1 }
  0xda   : > { %705 = vst.msk [vmem:[#allocation2 + $0xd9] sm:$0xff] %vm646_vm2, %v630_v49  ;;  %v633_v55 = vmax.f32 %v563_v50, 0.0  ;;  %v555_v56 = vadd.f32 %v3886_v34, %v554_v54  ;;  %v2900_v57 = vpop.f32.mrf.mxu0 }
  0xdb   : > { %692 = vst.msk [vmem:[#allocation2 + $0x39] sm:$0xff] %vm646_vm2, %v617_v52  ;;  %v615_v58 = vmax.f32 %v491_v53, 0.0  ;;  %v512_v59 = vadd.f32 %v2900_v57, %v3886_v34  ;;  %v2916_v60 = vpop.f32.mrf.mxu1 }
  0xdc   : > { %708 = vst.msk [vmem:[#allocation2 + $0xf9] sm:$0xff] %vm646_vm2, %v633_v55  ;;  %v631_v61 = vmax.f32 %v555_v56, 0.0  ;;  %v503_v62 = vpop.f32.mrf.mxu0  ;;  %v576_v63 = vadd.f32 %v2916_v60, %v3886_v34 }
  0xdd   : > { %690 = vst.msk [vmem:[#allocation2 + $0x21] sm:$0xff] %vm646_vm2, %v615_v58  ;;  %v620_v0 = vmax.f32 %v512_v59, 0.0  ;;  %v504_v1 = vadd.f32 %v3886_v34, %v503_v62  ;;  %v567_v2 = vpop.f32.mrf.mxu1 }
  0xde   : > { %706 = vst.msk [vmem:[#allocation2 + $0xe1] sm:$0xff] %vm646_vm2, %v631_v61  ;;  %v2901_v3 = vpop.f32.mrf.mxu0  ;;  %v636_v4 = vmax.f32 %v576_v63, 0.0  ;;  %v568_v5 = vadd.f32 %v3886_v34, %v567_v2  ;;  %v727_v12 = vld [vmem:[#allocation2 + $0x30] sm:$0xff] }
  0xdf   : > { %695 = vst.msk [vmem:[#allocation2 + $0x61] sm:$0xff] %vm646_vm2, %v620_v0  ;;  %v618_v6 = vmax.f32 %v504_v1, 0.0  ;;  %v515_v7 = vadd.f32 %v2901_v3, %v3886_v34  ;;  %v2917_v8 = vpop.f32.mrf.mxu1  ;;  %v3915_v17 = vld [vmem:[#allocation2 + $0xf0] sm:$0xff]  ;;  %v834_v32 = vrot.slane %v727_v12, 1  ;;  %v1011_v42 = vrot.slane %v727_v12, 2 }
  0xe0   : > { %711 = vst.msk [vmem:[#allocation2 + $0x121] sm:$0xff] %vm646_vm2, %v636_v4  ;;  %v634_v9 = vmax.f32 %v568_v5, 0.0  ;;  %v579_v10 = vadd.f32 %v2917_v8, %v3886_v34  ;;  %v506_v16 = vpop.f32.mrf.mxu0  ;;  %v3934_v31 = vld [vmem:[#allocation2 + $0x18] sm:$0xff]  ;;  %v874_v49 = vrot.slane %v3915_v17, 1  ;;  %v1051_v54 = vrot.slane %v3915_v17, 2 }
  0xe1   : > { %693 = vst.msk [vmem:[#allocation2 + $0x49] sm:$0xff] %vm646_vm2, %v618_v6  ;;  %v621_v11 = vmax.f32 %v515_v7, 0.0  ;;  %v507_v22 = vadd.f32 %v3886_v34, %v506_v16  ;;  %v570_v23 = vpop.f32.mrf.mxu1  ;;  %v3932_v30 = vld [vmem:[#allocation2 + $0xd8] sm:$0xff] }
  0xe2   : > { %v728_v13 = vld [vmem:[#allocation2 + $0x38] sm:$0xff]  ;;  %709 = vst.msk [vmem:[#allocation2 + $0x109] sm:$0xff] %vm646_vm2, %v634_v9  ;;  %v637_v14 = vmax.f32 %v579_v10, 0.0  ;;  %v729_v21 = vld [vmem:[#allocation2 + $0x40] sm:$0x3]  ;;  %v571_v29 = vadd.f32 %v3886_v34, %v570_v23  ;;  %v2904_v46 = vpop.f32.mrf.mxu0 }
  0xe3   : > { %v3036_v15 = vpack.i.bf16 %v728_v13, %v727_v12  ;;  %696 = vst.msk [vmem:[#allocation2 + $0x69] sm:$0xff] %vm646_vm2, %v621_v11  ;;  %v3917_v18 = vld [vmem:[#allocation2 + $0xf8] sm:$0xff]  ;;  %v835_v27 = vrot.slane %v728_v13, 1  ;;  %v837_v28 = vrot.slane %v729_v21, 1  ;;  %v619_v33 = vmax.f32 %v507_v22, 0.0  ;;  %v2920_v53 = vpop.f32.mrf.mxu1 }
  0xe4   : > { %712 = vst.msk [vmem:[#allocation2 + $0x129] sm:$0xff] %vm646_vm2, %v637_v14  ;;  %v3041_v24 = vpack.i.bf16 %v3917_v18, %v3915_v17  ;;  %v3927_v26 = vld [vmem:[#allocation2 + $0x20] sm:$0xff]  ;;  %v1012_v39 = vrot.slane %v728_v13, 2  ;;  %v1014_v40 = vrot.slane %v729_v21, 2  ;;  %v635_v41 = vmax.f32 %v571_v29, 0.0  ;;  %v519_v52 = vpop.f32.mrf.mxu0 }
  0xe5   : > { %3037 = vrot.lane.b32.xlu1 %v3036_v15, %s3736_s13  ;;  %3032 = vrot.lane.b32.xlu0 %v3036_v15, %s3737_s14  ;;  %v3925_v25 = vld [vmem:[#allocation2 + $0xe0] sm:$0xff]  ;;  %v3051_v36 = vpack.i.bf16 %v3927_v26, %v3934_v31  ;;  %v836_v37 = vsel %vm823_vm6, %v834_v32, %v835_v27  ;;  %v838_v38 = vsel %vm823_vm6, %v835_v27, %v837_v28  ;;  %v875_v50 = vrot.slane %v3917_v18, 1  ;;  %v583_v60 = vpop.f32.mrf.mxu1  ;;  %v726_v6 = vld [vmem:[#allocation2 + $0x28] sm:$0x3] }
  0xe6   : > { %v3061_v35 = vpack.i.bf16 %v3925_v25, %v3932_v30  ;;  %694 = vst.msk [vmem:[#allocation2 + $0x51] sm:$0xff] %vm646_vm2, %v619_v33  ;;  %v3071_v43 = vpack.i.bf16 %v838_v38, %v836_v37  ;;  %710 = vst.msk [vmem:[#allocation2 + $0x111] sm:$0xff] %vm646_vm2, %v635_v41  ;;  %v1013_v44 = vsel %vm1000_vm5, %v1011_v42, %v1012_v39  ;;  %v753_v47 = vld [vmem:[#allocation2 + $0x100] sm:$0x3]  ;;  %v1052_v57 = vrot.slane %v3917_v18, 2  ;;  %v2905_v59 = vpop.f32.mrf.mxu0 }
  0xe7   : > { %v1015_v45 = vsel %vm1000_vm5, %v1012_v39, %v1014_v40  ;;  %v877_v51 = vrot.slane %v753_v47, 1  ;;  %v876_v55 = vsel %vm823_vm6, %v874_v49, %v875_v50  ;;  %v1054_v58 = vrot.slane %v753_v47, 2  ;;  %v2921_v5 = vpop.f32.mrf.mxu1  ;;  %v750_v33 = vld [vmem:[#allocation2 + $0xe8] sm:$0x3] }
  0xe8   : > { %v3076_v48 = vpack.i.bf16 %v1015_v45, %v1013_v44  ;;  %v528_v62 = vadd.f32 %v2904_v46, %v3886_v34  ;;  %v520_v63 = vadd.f32 %v3886_v34, %v519_v52  ;;  %v1053_v0 = vsel %vm1000_vm5, %v1051_v54, %v1052_v57  ;;  %v522_v4 = vpop.f32.mrf.mxu0 }
  0xe9   : > { %3042 = vrot.lane.b32.xlu1 %v3041_v24, %s3737_s14  ;;  %3047 = vrot.lane.b32.xlu0 %v3041_v24, %s3736_s13  ;;  %v878_v56 = vsel %vm823_vm6, %v875_v50, %v877_v51  ;;  %v1055_v1 = vsel %vm1000_vm5, %v1052_v57, %v1054_v58  ;;  %v531_v2 = vadd.f32 %v2905_v59, %v3886_v34  ;;  %v830_v14 = vrot.slane %v3927_v26, 1  ;;  %v586_v17 = vpop.f32.mrf.mxu1 }
  0xea   : > { %v3106_v61 = vpack.i.bf16 %v878_v56, %v876_v55  ;;  %v592_v3 = vadd.f32 %v2920_v53, %v3886_v34  ;;  %v624_v7 = vmax.f32 %v528_v62, 0.0  ;;  %v622_v8 = vmax.f32 %v520_v63, 0.0  ;;  %v2908_v38 = vpop.f32.mrf.mxu0 }
  0xeb   : > { %v625_v9 = vmax.f32 %v531_v2, 0.0  ;;  %v3111_v11 = vpack.i.bf16 %v1055_v1, %v1053_v0  ;;  %v523_v12 = vadd.f32 %v3886_v34, %v522_v4  ;;  %v584_v13 = vadd.f32 %v3886_v34, %v583_v60 }
  0xec   : > { %v640_v10 = vmax.f32 %v592_v3, 0.0  ;;  %699 = vst.msk [vmem:[#allocation2 + $0x91] sm:$0xff] %vm646_vm2, %v624_v7  ;;  %697 = vst.msk [vmem:[#allocation2 + $0x79] sm:$0xff] %vm646_vm2, %v622_v8  ;;  %v832_v15 = vrot.slane %v726_v6, 1  ;;  %v595_v16 = vadd.f32 %v2921_v5, %v3886_v34  ;;  %v829_v22 = vrot.slane %v3934_v31, 1  ;;  %v733_v7 = vld [vmem:[#allocation2 + $0x60] sm:$0xff] }
  0xed   : > { %3062 = vrot.lane.b32.xlu0 %v3061_v35, %s3737_s14  ;;  %3052 = vrot.lane.b32.xlu1 %v3051_v36, %s3737_s14  ;;  %700 = vst.msk [vmem:[#allocation2 + $0x99] sm:$0xff] %vm646_vm2, %v625_v9  ;;  %v623_v18 = vmax.f32 %v523_v12, 0.0  ;;  %v638_v21 = vmax.f32 %v584_v13, 0.0  ;;  %v587_v24 = vadd.f32 %v3886_v34, %v586_v17  ;;  %v1007_v29 = vrot.slane %v3927_v26, 2  ;;  %v734_v8 = vld [vmem:[#allocation2 + $0x68] sm:$0xff] }
  0xee   : > { %715 = vst.msk [vmem:[#allocation2 + $0x151] sm:$0xff] %vm646_vm2, %v640_v10  ;;  %v641_v23 = vmax.f32 %v595_v16, 0.0  ;;  %v831_v27 = vsel %vm823_vm6, %v829_v22, %v830_v14  ;;  %v833_v28 = vsel %vm823_vm6, %v830_v14, %v832_v15  ;;  %v1009_v32 = vrot.slane %v726_v6, 2 }
  0xef   : > { %698 = vst.msk [vmem:[#allocation2 + $0x81] sm:$0xff] %vm646_vm2, %v623_v18  ;;  %713 = vst.msk [vmem:[#allocation2 + $0x139] sm:$0xff] %vm646_vm2, %v638_v21  ;;  %v1006_v36 = vrot.slane %v3934_v31, 2  ;;  %v3126_v37 = vpack.i.bf16 %v833_v28, %v831_v27  ;;  %v1047_v26 = vrot.slane %v3925_v25, 2  ;;  %v1049_v41 = vrot.slane %v750_v33, 2  ;;  %v535_v31 = vpop.f32.mrf.mxu0  ;;  %v4030_v18 = vld [vmem:[#allocation2 + $0x120] sm:$0xff] }
  0xf0   : > { %716 = vst.msk [vmem:[#allocation2 + $0x159] sm:$0xff] %vm646_vm2, %v641_v23  ;;  %v1010_v40 = vsel %vm1000_vm5, %v1007_v29, %v1009_v32  ;;  %v1046_v42 = vrot.slane %v3932_v30, 2  ;;  %v870_v47 = vrot.slane %v3925_v25, 1  ;;  %v869_v49 = vrot.slane %v3932_v30, 1  ;;  %v4032_v21 = vld [vmem:[#allocation2 + $0x128] sm:$0xff]  ;;  %v4046_v28 = vld [vmem:[#allocation2 + $0x50] sm:$0xff] }
  0xf1   : > { %3072 = vrot.lane.b32.xlu0 %v3071_v43, %s3738_s15  ;;  %3057 = vrot.lane.b32.xlu1 %v3061_v35, %s3736_s13  ;;  %v639_v35 = vmax.f32 %v587_v24, 0.0  ;;  %v1008_v39 = vsel %vm1000_vm5, %v1006_v36, %v1007_v29  ;;  %v1050_v46 = vsel %vm1000_vm5, %v1047_v26, %v1049_v41  ;;  %v2909_v52 = vpop.f32.mrf.mxu0  ;;  %v544_v25 = vadd.f32 %v2908_v38, %v3886_v34  ;;  %v4044_v27 = vld [vmem:[#allocation2 + $0x48] sm:$0xff]  ;;  %v735_v29 = vld [vmem:[#allocation2 + $0x70] sm:$0x3] }
  0xf2   : > { %v3131_v44 = vpack.i.bf16 %v1010_v40, %v1008_v39  ;;  %v1048_v45 = vsel %vm1000_vm5, %v1046_v42, %v1047_v26  ;;  %v871_v53 = vsel %vm823_vm6, %v869_v49, %v870_v47  ;;  %v536_v58 = vadd.f32 %v3886_v34, %v535_v31  ;;  %v4056_v38 = vld [vmem:[#allocation2 + $0x110] sm:$0xff] }
  0xf3   : > { %714 = vst.msk [vmem:[#allocation2 + $0x141] sm:$0xff] %vm646_vm2, %v639_v35  ;;  %v3151_v51 = vpack.i.bf16 %v1050_v46, %v1048_v45  ;;  %v628_v57 = vmax.f32 %v544_v25, 0.0  ;;  %v538_v59 = vpop.f32.mrf.mxu0  ;;  %v3181_v16 = vpack.i.bf16 %v734_v8, %v733_v7  ;;  %v3196_v32 = vpack.i.bf16 %v4046_v28, %v4044_v27 }
  0xf4   : > { %v626_v63 = vmax.f32 %v536_v58, 0.0  ;;  %v539_v1 = vadd.f32 %v3886_v34, %v538_v59  ;;  %v844_v39 = vrot.slane %v733_v7, 1  ;;  %v845_v40 = vrot.slane %v734_v8, 1 }
  0xf5   : > { %3077 = vrot.lane.b32.xlu0 %v3076_v48, %s3739_s16  ;;  %3067 = vrot.lane.b32.xlu1 %v3071_v43, %s3735_s10  ;;  %v4008_v30 = vld [vmem:[#allocation2 + $0x150] sm:$0xff]  ;;  %703 = vst.msk [vmem:[#allocation2 + $0xc1] sm:$0xff] %vm646_vm2, %v628_v57  ;;  %v847_v26 = vrot.slane %v735_v29, 1  ;;  %v1021_v42 = vrot.slane %v733_v7, 2  ;;  %v1022_v46 = vrot.slane %v734_v8, 2  ;;  %v885_v25 = vrot.slane %v4032_v21, 1 }
  0xf6   : > { %v894_v4 = vrot.slane %v4008_v30, 1  ;;  %701 = vst.msk [vmem:[#allocation2 + $0xa9] sm:$0xff] %vm646_vm2, %v626_v63  ;;  %v627_v10 = vmax.f32 %v539_v1, 0.0  ;;  %v846_v31 = vsel %vm823_vm6, %v844_v39, %v845_v40  ;;  %v1061_v58 = vrot.slane %v4030_v18, 2  ;;  %v732_v1 = vld [vmem:[#allocation2 + $0x58] sm:$0x3] }
  0xf7   : > { %v4010_v60 = vld [vmem:[#allocation2 + $0x158] sm:$0xff]  ;;  %v765_v62 = vld [vmem:[#allocation2 + $0x160] sm:$0x3]  ;;  %v848_v45 = vsel %vm823_vm6, %v845_v40, %v847_v26  ;;  %v1062_v59 = vrot.slane %v4032_v21, 2  ;;  %v1016_v8 = vrot.slane %v4044_v27, 2 }
  0xf8   : > { %v895_v5 = vrot.slane %v4010_v60, 1  ;;  %v897_v9 = vrot.slane %v765_v62, 1  ;;  %702 = vst.msk [vmem:[#allocation2 + $0xb1] sm:$0xff] %vm646_vm2, %v627_v10  ;;  %v1072_v35 = vrot.slane %v4010_v60, 2  ;;  %v1074_v36 = vrot.slane %v765_v62, 2  ;;  %v3678_v10 = vld [vmem:[%s5257_s2 + $0x8] sm:$0xff]  }
  0xf9   : > { %3092 = vrot.lane.b32.xlu0 %v3076_v48, %s3734_s9  ;;  %3082 = vrot.lane.b32.xlu1 %v3071_v43, %s3740_s17  ;;  %v2924_v43 = vpop.f32.mrf.mxu1  ;;  %v3216_v49 = vpack.i.bf16 %v848_v45, %v846_v31  ;;  %v1063_v63 = vsel %vm1000_vm5, %v1061_v58, %v1062_v59 }
  0xfa   : > { %v608_v2 = vadd.f32 %v2924_v43, %v3886_v34  ;;  %v896_v22 = vsel %vm823_vm6, %v894_v4, %v895_v5  ;;  %v898_v23 = vsel %vm823_vm6, %v895_v5, %v897_v9  ;;  %v839_v4 = vrot.slane %v4044_v27, 1 }
  0xfb   : > { %v599_v50 = vpop.f32.mrf.mxu1  ;;  %v4042_v24 = vpack.i.bf16 %v898_v23, %v896_v22  ;;  %v840_v5 = vrot.slane %v4046_v28, 1  ;;  %v1017_v9 = vrot.slane %v4046_v28, 2 }
  0xfc   : > { %v600_v6 = vadd.f32 %v3886_v34, %v599_v50  ;;  %v1023_v50 = vsel %vm1000_vm5, %v1021_v42, %v1022_v46  ;;  %v4127_v42 = vpop.permute.xlu0 %3022 }
  0xfd   : > { %3107 = vrot.lane.b32.xlu0 %v3106_v61, %s3740_s17  ;;  %3087 = vrot.lane.b32.xlu1 %v3076_v48, %s3741_s18  ;;  %v872_v48 = vrot.slane %v750_v33, 1  ;;  %v2925_v55 = vpop.f32.mrf.mxu1  ;;  %v1071_v33 = vrot.slane %v4008_v30, 2 }
  0xfe   : > { %v611_v12 = vadd.f32 %v2925_v55, %v3886_v34  ;;  %v642_v13 = vmax.f32 %v600_v6, 0.0  ;;  %v842_v6 = vrot.slane %v732_v1, 1 }
  0xff   : > { %v873_v54 = vsel %vm823_vm6, %v870_v47, %v872_v48  ;;  %v602_v3 = vpop.f32.mrf.mxu1  ;;  %v1073_v43 = vsel %vm1000_vm5, %v1071_v33, %v1072_v35  ;;  %v1024_v47 = vrot.slane %v735_v29, 2 }
 0x100   : > { %v3146_v56 = vpack.i.bf16 %v873_v54, %v871_v53  ;;  %v603_v14 = vadd.f32 %v3886_v34, %v602_v3  ;;  %v645_v15 = vmax.f32 %v611_v12, 0.0  ;;  %717 = vst.msk [vmem:[#allocation2 + $0x169] sm:$0xff] %vm646_vm2, %v642_v13  ;;  %v884_v54 = vrot.slane %v4030_v18, 1 }
 0x101   : > { %3112 = vrot.lane.b32.xlu0 %v3111_v11, %s3741_s18  ;;  %3097 = vrot.lane.b32.xlu1 %v3106_v61, %s3738_s15  ;;  %v843_v12 = vsel %vm823_vm6, %v840_v5, %v842_v6  ;;  %v1019_v13 = vrot.slane %v732_v1, 2 }
 0x102   : > { %v643_v17 = vmax.f32 %v603_v14, 0.0  ;;  %720 = vst.msk [vmem:[#allocation2 + $0x189] sm:$0xff] %vm646_vm2, %v645_v15  ;;  %v756_v14 = vld [vmem:[#allocation2 + $0x118] sm:$0x3] }
 0x103   : > { %v1020_v22 = vsel %vm1000_vm5, %v1017_v9, %v1019_v13  ;;  %v882_v27 = vrot.slane %v756_v14, 1  ;;  %v1059_v39 = vrot.slane %v756_v14, 2  ;;  %v738_v13 = vld [vmem:[#allocation2 + $0x88] sm:$0x3] }
 0x104   : > { %718 = vst.msk [vmem:[#allocation2 + $0x171] sm:$0xff] %vm646_vm2, %v643_v17  ;;  %v3679_v17 = vld [vmem:[%s5257_s2] sm:$0xff]  }
 0x105   : > { %3122 = vrot.lane.b32.xlu0 %v3111_v11, %s3734_s9  ;;  %3102 = vrot.lane.b32.xlu1 %v3111_v11, %s3739_s16  ;;  %v644_v11 = vmax.f32 %v608_v2, 0.0  ;;  %v3677_v2 = vld [vmem:[%s5257_s2 + $0x10] ss:$0 sps:$4 sm:$0x33]  }
 0x106   : > { %3002 = vmatprep.subr.msk.bf16.mxu1 %vm2133_vm7, %v3677_v2  ;;  %v2135_v7 = vsel %vm2133_vm7, %v3677_v2, 0 }
 0x107   : > { %719 = vst.msk [vmem:[#allocation2 + $0x181] sm:$0xff] %vm646_vm2, %v644_v11  ;;  %2927 = vmatpush3.bf16.msra.mxu1 %v2135_v7  ;;  %v841_v11 = vsel %vm823_vm6, %v839_v4, %v840_v5 }
 0x108   : > { %2928 = vmatprep.subr.bf16.mxu1 %v3678_v10  ;;  %v3286_v15 = vpack.i.bf16 %v843_v12, %v841_v11 }
 0x109   : > { %3117 = vrot.lane.b32.xlu1 %v3106_v61, %s3735_s10  ;;  %3127 = vrot.lane.b32.xlu0 %v3126_v37, %s3735_s10  ;;  %v547_v61 = vadd.f32 %v2909_v52, %v3886_v34  ;;  %v3191_v34 = vpack.i.bf16 %v4032_v21, %v4030_v18  ;;  %v759_v52 = vld [vmem:[#allocation2 + $0x130] sm:$0x3] }
 0x10a   : > { %v887_v55 = vrot.slane %v759_v52, 1 }
 0x10b   : > { %v629_v0 = vmax.f32 %v547_v61, 0.0  ;;  %v1064_v61 = vrot.slane %v759_v52, 2  ;;  %2929 = vmatpush3.bf16.msra.mxu1 %v3678_v10  ;;  %v741_v52 = vld [vmem:[#allocation2 + $0xa0] sm:$0x3] }
 0x10c   : > { %v888_v57 = vsel %vm823_vm6, %v885_v25, %v887_v55  ;;  %2930 = vmatprep.subr.bf16.mxu1 %v3679_v17  ;;  %v4155_v55 = vld [vmem:[#allocation2 + $0x138] sm:$0xff]  ;;  %v1034_v2 = vrot.slane %v741_v52, 2 }
 0x10d   : > { %3137 = vrot.lane.b32.xlu1 %v3126_v37, %s3738_s15  ;;  %3132 = vrot.lane.b32.xlu0 %v3131_v44, %s3734_s9  ;;  %704 = vst.msk [vmem:[#allocation2 + $0xc9] sm:$0xff] %vm646_vm2, %v629_v0  ;;  %v4054_v37 = vld [vmem:[#allocation2 + $0x108] sm:$0xff]  ;;  %v1065_v0 = vsel %vm1000_vm5, %v1062_v59, %v1064_v61 }
 0x10e   : > { %v3206_v41 = vpack.i.bf16 %v4056_v38, %v4054_v37  ;;  %v3251_v3 = vpack.i.bf16 %v1065_v0, %v1063_v63  ;;  %v879_v23 = vrot.slane %v4054_v37, 1 }
 0x10f   : > { %2931 = vmatpush3.bf16.msra.mxu1 %v3679_v17 }
 0x111   : > { %3142 = vrot.lane.b32.xlu1 %v3131_v44, %s3739_s16  ;;  %3152 = vrot.lane.b32.xlu0 %v3151_v51, %s3741_s18  ;;  %v1075_v44 = vsel %vm1000_vm5, %v1072_v35, %v1074_v36  ;;  %v1056_v35 = vrot.slane %v4054_v37, 2  ;;  %v1057_v36 = vrot.slane %v4056_v38, 2 }
 0x112   : > { %v4068_v48 = vpack.i.bf16 %v1075_v44, %v1073_v43  ;;  %v739_v43 = vld [vmem:[#allocation2 + $0x90] sm:$0xff] }
 0x113   : > { %v1058_v40 = vsel %vm1000_vm5, %v1056_v35, %v1057_v36  ;;  %v1060_v26 = vsel %vm1000_vm5, %v1057_v36, %v1059_v39 }
 0x114   : > { %v3321_v37 = vpack.i.bf16 %v1060_v26, %v1058_v40 }
 0x115   : > { %3147 = vrot.lane.b32.xlu1 %v3146_v56, %s3740_s17  ;;  %3167 = vrot.lane.b32.xlu0 %v3146_v56, %s3738_s15 }
 0x119   : > { %3157 = vrot.lane.b32.xlu1 %v3146_v56, %s3735_s10  ;;  %3172 = vrot.lane.b32.xlu0 %v3151_v51, %s3739_s16  ;;  %v886_v56 = vsel %vm823_vm6, %v884_v54, %v885_v25 }
 0x11a   : > { %v3246_v62 = vpack.i.bf16 %v888_v57, %v886_v56  ;;  %v4157_v56 = vld [vmem:[#allocation2 + $0x140] sm:$0xff]  ;;  %v857_v57 = vrot.slane %v741_v52, 1 }
 0x11b   : > { %v3366_v61 = vpack.i.bf16 %v4157_v56, %v4155_v55 }
 0x11d   : > { %3162 = vrot.lane.b32.xlu1 %v3151_v51, %s3734_s9  ;;  %3182 = vrot.lane.b32.xlu0 %v3181_v16, %s3736_s13  ;;  %v1025_v51 = vsel %vm1000_vm5, %v1022_v46, %v1024_v47 }
 0x11e   : > { %v3221_v53 = vpack.i.bf16 %v1025_v51, %v1023_v50  ;;  %v4143_v50 = vld [vmem:[#allocation2 + $0x78] sm:$0xff]  ;;  %v4145_v51 = vld [vmem:[#allocation2 + $0x80] sm:$0xff] }
 0x11f   : > { %v3356_v25 = vpack.i.bf16 %v4145_v51, %v4143_v50  ;;  %v850_v17 = vrot.slane %v4145_v51, 1  ;;  %v1026_v35 = vrot.slane %v4143_v50, 2  ;;  %v1027_v36 = vrot.slane %v4145_v51, 2 }
 0x121   : > { %3177 = vrot.lane.b32.xlu1 %v3181_v16, %s3737_s14  ;;  %3192 = vrot.lane.b32.xlu0 %v3191_v34, %s3736_s13  ;;  %v1018_v16 = vsel %vm1000_vm5, %v1016_v8, %v1017_v9 }
 0x122   : > { %v3291_v28 = vpack.i.bf16 %v1020_v22, %v1018_v16  ;;  %v849_v16 = vrot.slane %v4143_v50, 1  ;;  %v852_v22 = vrot.slane %v738_v13, 1 }
 0x125   : > { %3187 = vrot.lane.b32.xlu1 %v3191_v34, %s3737_s14  ;;  %3197 = vrot.lane.b32.xlu0 %v3196_v32, %s3736_s13  ;;  %v880_v34 = vrot.slane %v4056_v38, 1  ;;  %v740_v38 = vld [vmem:[#allocation2 + $0x98] sm:$0xff] }
 0x126   : > { %v3336_v45 = vpack.i.bf16 %v740_v38, %v739_v43  ;;  %v1032_v1 = vrot.slane %v740_v38, 2 }
 0x127   : > { %v881_v29 = vsel %vm823_vm6, %v879_v23, %v880_v34  ;;  %v3024_v23 = vunpack.i.l.bf16 %v4127_v42 }
 0x128   : > { %v1035_v7 = vsel %vm1000_vm5, %v1032_v1, %v1034_v2 }
 0x129   : > { %3207 = vrot.lane.b32.xlu1 %v3206_v41, %s3736_s13  ;;  %3202 = vrot.lane.b32.xlu0 %v3196_v32, %s3737_s14  ;;  %v883_v32 = vsel %vm823_vm6, %v880_v34, %v882_v27  ;;  %v1779_v39 = vsel %vm646_vm2, %v3869_v19, %v3024_v23  ;;  %v1028_v19 = vsel %vm1000_vm5, %v1026_v35, %v1027_v36 }
 0x12a   : > { %v3306_v33 = vpack.i.bf16 %v883_v32, %v881_v29  ;;  %v853_v29 = vsel %vm823_vm6, %v850_v17, %v852_v22  ;;  %v3025_v32 = vunpack.i.h.bf16 %v4127_v42  ;;  %v1029_v42 = vrot.slane %v738_v13, 2 }
 0x12c   : > { %v1030_v52 = vsel %vm1000_vm5, %v1027_v36, %v1029_v42 }
 0x12d   : > { %3217 = vrot.lane.b32.xlu1 %v3216_v49, %s3738_s15  ;;  %3212 = vrot.lane.b32.xlu0 %v3206_v41, %s3737_s14  ;;  %v4125_v41 = vpop.permute.xlu1 %3027 }
 0x131   : > { %3222 = vrot.lane.b32.xlu1 %v3221_v53, %s3739_s16  ;;  %3227 = vrot.lane.b32.xlu0 %v3216_v49, %s3740_s17 }
 0x135   : > { %3237 = vrot.lane.b32.xlu1 %v3216_v49, %s3735_s10  ;;  %3232 = vrot.lane.b32.xlu0 %v3221_v53, %s3741_s18  ;;  %v3346_v49 = vpack.i.bf16 %v4010_v60, %v4008_v30  ;;  %v854_v30 = vrot.slane %v739_v43, 1  ;;  %v855_v60 = vrot.slane %v740_v38, 1  ;;  %v4221_v38 = vld [vmem:[#allocation2 + $0x148] sm:$0x3] }
 0x137   : > { %v856_v63 = vsel %vm823_vm6, %v854_v30, %v855_v60  ;;  %v858_v0 = vsel %vm823_vm6, %v855_v60, %v857_v57  ;;  %v892_v30 = vrot.slane %v4221_v38, 1 }
 0x138   : > { %v3376_v5 = vpack.i.bf16 %v858_v0, %v856_v63  ;;  %v3436_v63 = vpack.i.bf16 %v1030_v52, %v1028_v19 }
 0x139   : > { %3247 = vrot.lane.b32.xlu1 %v3246_v62, %s3738_s15  ;;  %3242 = vrot.lane.b32.xlu0 %v3221_v53, %s3734_s9 }
 0x13d   : > { %3252 = vrot.lane.b32.xlu1 %v3251_v3, %s3739_s16  ;;  %3257 = vrot.lane.b32.xlu0 %v3246_v62, %s3740_s17 }
 0x141   : > { %3267 = vrot.lane.b32.xlu1 %v3246_v62, %s3735_s10  ;;  %3262 = vrot.lane.b32.xlu0 %v3251_v3, %s3741_s18  ;;  %v1031_v62 = vrot.slane %v739_v43, 2  ;;  %v3030_v43 = vunpack.i.h.bf16 %v4125_v41 }
 0x143   : > { %v1033_v6 = vsel %vm1000_vm5, %v1031_v62, %v1032_v1 }
 0x144   : > { %v3381_v10 = vpack.i.bf16 %v1035_v7, %v1033_v6 }
 0x145   : > { %3287 = vrot.lane.b32.xlu1 %v3286_v15, %s3735_s10  ;;  %3272 = vrot.lane.b32.xlu0 %v3251_v3, %s3734_s9 }
 0x149   : > { %3292 = vrot.lane.b32.xlu1 %v3291_v28, %s3734_s9  ;;  %3277 = vrot.lane.b32.xlu0 %v3286_v15, %s3740_s17 }
 0x14d   : > { %3307 = vrot.lane.b32.xlu1 %v3306_v33, %s3740_s17  ;;  %3282 = vrot.lane.b32.xlu0 %v3291_v28, %s3741_s18 }
 0x151   : > { %3317 = vrot.lane.b32.xlu1 %v3306_v33, %s3735_s10  ;;  %3297 = vrot.lane.b32.xlu0 %v3286_v15, %s3738_s15 }
 0x155   : > { %3322 = vrot.lane.b32.xlu1 %v3321_v37, %s3734_s9  ;;  %3302 = vrot.lane.b32.xlu0 %v3291_v28, %s3739_s16  ;;  %v851_v28 = vsel %vm823_vm6, %v849_v16, %v850_v17 }
 0x157   : > { %v4131_v44 = vpop.permute.xlu1 %3037  ;;  %v4133_v31 = vpop.permute.xlu0 %3032 }
 0x158   : > { %v3040_v13 = vunpack.i.h.bf16 %v4131_v44  ;;  %v3039_v16 = vunpack.i.l.bf16 %v4131_v44 }
 0x159   : > { %3337 = vrot.lane.b32.xlu1 %v3336_v45, %s3737_s14  ;;  %3312 = vrot.lane.b32.xlu0 %v3321_v37, %s3741_s18 }
 0x15b   : > { %v4137_v46 = vpop.permute.xlu1 %3042  ;;  %v4139_v47 = vpop.permute.xlu0 %3047 }
 0x15c   : > { %5278 = vst [vmem:[#allocation3_spill] sm:$0xff] %v4139_v47 }
 0x15d   : > { %3347 = vrot.lane.b32.xlu1 %v3346_v49, %s3737_s14  ;;  %3327 = vrot.lane.b32.xlu0 %v3306_v33, %s3738_s15  ;;  %v3029_v33 = vunpack.i.l.bf16 %v4125_v41  ;;  %v889_v41 = vrot.slane %v4155_v55, 1 }
 0x15f   : > { %v4149_v53 = vpop.permute.xlu0 %3062  ;;  %v4151_v54 = vpop.permute.xlu1 %3052 }
 0x160   : > { %5279 = vst [vmem:[#allocation4_spill] sm:$0xff] %v4149_v53  ;;  %v3055_v60 = vunpack.i.h.bf16 %v4151_v54  ;;  %v3054_v57 = vunpack.i.l.bf16 %v4151_v54 }
 0x161   : > { %3357 = vrot.lane.b32.xlu1 %v3356_v25, %s3736_s13  ;;  %3332 = vrot.lane.b32.xlu0 %v3321_v37, %s3739_s16  ;;  %v3421_v37 = vpack.i.bf16 %v853_v29, %v851_v28 }
 0x163   : > { %v4161_v58 = vpop.permute.xlu0 %3072  ;;  %v4163_v59 = vpop.permute.xlu1 %3057 }
 0x164   : > { %5280 = vst [vmem:[#allocation5_spill] sm:$0xff] %v4163_v59  ;;  %v3682_v59 = vld [vmem:[#allocation2 + $0x18] sm:$0xff] }
 0x165   : > { %3367 = vrot.lane.b32.xlu1 %v3366_v61, %s3736_s13  ;;  %3342 = vrot.lane.b32.xlu0 %v3336_v45, %s3736_s13  ;;  %v1780_v45 = vsel %vm646_vm2, %v3871_v20, %v3025_v32  ;;  %v1066_v32 = vrot.slane %v4155_v55, 2  ;;  %v1069_v55 = vrot.slane %v4221_v38, 2 }
 0x166   : > { %v1812_v20 = vsel %vm400_vm1, %v1780_v45, %v3030_v43 }
 0x167   : > { %v4171_v3 = vpop.permute.xlu0 %3077  ;;  %v4173_v4 = vpop.permute.xlu1 %3067  ;;  %v1845_v54 = vsel %vm1843_vm8, %v1812_v20, %v3055_v60  ;;  %v745_v60 = vld [vmem:[#allocation2 + $0xc0] sm:$0xff] }
 0x169   : > { %3377 = vrot.lane.b32.xlu1 %v3376_v5, %s3738_s15  ;;  %3352 = vrot.lane.b32.xlu0 %v3346_v49, %s3736_s13  ;;  %v1811_v49 = vsel %vm400_vm1, %v1779_v39, %v3029_v33 }
 0x16a   : > { %v1844_v6 = vsel %vm1843_vm8, %v1811_v49, %v3054_v57  ;;  %v1067_v49 = vrot.slane %v4157_v56, 2  ;;  %v746_v57 = vld [vmem:[#allocation2 + $0xc8] sm:$0xff] }
 0x16b   : > { %v4179_v8 = vpop.permute.xlu0 %3092  ;;  %v4181_v9 = vpop.permute.xlu1 %3082 }
 0x16c   : > { %v3085_v33 = vunpack.i.h.bf16 %v4181_v9  ;;  %v3084_v35 = vunpack.i.l.bf16 %v4181_v9  ;;  %v1068_v38 = vsel %vm1000_vm5, %v1066_v32, %v1067_v49  ;;  %v1041_v32 = vrot.slane %v745_v60, 2 }
 0x16d   : > { %3382 = vrot.lane.b32.xlu1 %v3381_v10, %s3739_s16  ;;  %3362 = vrot.lane.b32.xlu0 %v3356_v25, %s3737_s14  ;;  %v890_v25 = vrot.slane %v4157_v56, 1 }
 0x16f   : > { %v4185_v11 = vpop.permute.xlu0 %3107  ;;  %v4187_v12 = vpop.permute.xlu1 %3087  ;;  %v891_v2 = vsel %vm823_vm6, %v889_v41, %v890_v25 }
 0x170   : > { %5281 = vst [vmem:[#allocation6_spill] sm:$0xff] %v4185_v11  ;;  %v3090_v43 = vunpack.i.h.bf16 %v4187_v12  ;;  %v3089_v45 = vunpack.i.l.bf16 %v4187_v12 }
 0x171   : > { %3397 = vrot.lane.b32.xlu1 %v3376_v5, %s3735_s10  ;;  %3372 = vrot.lane.b32.xlu0 %v3366_v61, %s3737_s14 }
 0x173   : > { %v4191_v14 = vpop.permute.xlu0 %3112  ;;  %v4193_v15 = vpop.permute.xlu1 %3097 }
 0x174   : > { %5282 = vst [vmem:[#allocation7_spill] sm:$0xff] %v4191_v14 }
 0x175   : > { %3407 = vrot.lane.b32.xlu1 %v4042_v24, %s3738_s15  ;;  %3387 = vrot.lane.b32.xlu0 %v3376_v5, %s3740_s17  ;;  %v893_v5 = vsel %vm823_vm6, %v890_v25, %v892_v30  ;;  %v1070_v25 = vsel %vm1000_vm5, %v1067_v49, %v1069_v55 }
 0x176   : > { %v3451_v29 = vpack.i.bf16 %v893_v5, %v891_v2  ;;  %v3466_v20 = vpack.i.bf16 %v1070_v25, %v1068_v38  ;;  %v742_v2 = vld [vmem:[#allocation2 + $0xa8] sm:$0xff]  ;;  %v743_v5 = vld [vmem:[#allocation2 + $0xb0] sm:$0xff] }
 0x177   : > { %v4201_v34 = vpop.permute.xlu0 %3122  ;;  %v4203_v27 = vpop.permute.xlu1 %3102  ;;  %v1036_v38 = vrot.slane %v742_v2, 2  ;;  %v1037_v25 = vrot.slane %v743_v5, 2 }
 0x179   : > { %3412 = vrot.lane.b32.xlu1 %v4068_v48, %s3739_s16  ;;  %3392 = vrot.lane.b32.xlu0 %v3381_v10, %s3741_s18 }
 0x17b   : > { %v4216_v40 = vpop.permute.xlu1 %3117  ;;  %v4218_v26 = vpop.permute.xlu0 %3127 }
 0x17d   : > { %3422 = vrot.lane.b32.xlu1 %v3421_v37, %s3740_s17  ;;  %3402 = vrot.lane.b32.xlu0 %v3381_v10, %s3734_s9 }
 0x17f   : > { %v3138_v50 = vpop.permute.xlu1 %3137  ;;  %v4229_v51 = vpop.permute.xlu0 %3132 }
 0x180   : > { %v3140_v61 = vunpack.i.h.bf16 %v3138_v50  ;;  %v3139_v62 = vunpack.i.l.bf16 %v3138_v50 }
 0x181   : > { %3432 = vrot.lane.b32.xlu1 %v3421_v37, %s3735_s10  ;;  %3417 = vrot.lane.b32.xlu0 %v4042_v24, %s3740_s17 }
 0x182   : > { %v1878_v17 = vsel %vm1876_vm9, %v1845_v54, %v3140_v61  ;;  %v1877_v22 = vsel %vm1876_vm9, %v1844_v6, %v3139_v62 }
 0x183   : > { %v3143_v0 = vpop.permute.xlu1 %3142  ;;  %v4241_v1 = vpop.permute.xlu0 %3152 }
 0x184   : > { %5283 = vst [vmem:[#allocation8_spill] sm:$0xff] %v4241_v1  ;;  %v3145_v7 = vunpack.i.h.bf16 %v3143_v0  ;;  %v3144_v10 = vunpack.i.l.bf16 %v3143_v0  ;;  %v3481_v0 = vpack.i.bf16 %v746_v57, %v745_v60 }
 0x185   : > { %3437 = vrot.lane.b32.xlu1 %v3436_v63, %s3734_s9  ;;  %3427 = vrot.lane.b32.xlu0 %v3436_v63, %s3741_s18 }
 0x186   : > { %v1910_v23 = vsel %vm1909_vm10, %v1877_v22, %v3144_v10  ;;  %v1911_v28 = vsel %vm1909_vm10, %v1878_v17, %v3145_v7  ;;  %v3491_v7 = vpack.i.bf16 %v743_v5, %v742_v2  ;;  %v4299_v10 = vld [vmem:[#allocation2 + $0x168] sm:$0xff]  ;;  %v865_v17 = vrot.slane %v746_v57, 1 }
 0x187   : > { %v1943_v44 = vsel %vm1942_vm11, %v1910_v23, %v3039_v16  ;;  %v1944_v36 = vsel %vm1942_vm11, %v1911_v28, %v3040_v13  ;;  %v4260_v39 = vpop.permute.xlu1 %3147  ;;  %v4262_v42 = vpop.permute.xlu0 %3167  ;;  %v4301_v13 = vld [vmem:[#allocation2 + $0x170] sm:$0xff]  ;;  %v864_v16 = vrot.slane %v745_v60, 1 }
 0x188   : > { %5284 = vst [vmem:[#allocation9_spill] sm:$0xff] %v4260_v39  ;;  %5285 = vst [vmem:[#allocation10_spill] sm:$0xff] %v4262_v42  ;;  %v1976_v9 = vsel %vm1975_vm12, %v1943_v44, %v3084_v35  ;;  %v1977_v19 = vsel %vm1975_vm12, %v1944_v36, %v3085_v33  ;;  %v1042_v36 = vrot.slane %v746_v57, 2  ;;  %v770_v57 = vld [vmem:[#allocation2 + $0x188] sm:$0xff] }
 0x189   : > { %3452 = vrot.lane.b32.xlu1 %v3451_v29, %s3740_s17  ;;  %3442 = vrot.lane.b32.xlu0 %v3421_v37, %s3738_s15  ;;  %v2009_v50 = vsel %vm2008_vm13, %v1976_v9, %v3089_v45  ;;  %v2010_v52 = vsel %vm2008_vm13, %v1977_v19, %v3090_v43  ;;  %v866_v33 = vsel %vm823_vm6, %v864_v16, %v865_v17  ;;  %v744_v43 = vld [vmem:[#allocation2 + $0xb8] sm:$0x3]  ;;  %v859_v45 = vrot.slane %v742_v2, 1 }
 0x18a   : > { %v2041_v56 = vpack.c.bf16 %v2010_v52, %v2009_v50  ;;  %v860_v19 = vrot.slane %v743_v5, 1  ;;  %v862_v50 = vrot.slane %v744_v43, 1  ;;  %v1043_v52 = vsel %vm1000_vm5, %v1041_v32, %v1042_v36  ;;  %v768_v5 = vld [vmem:[#allocation2 + $0x178] sm:$0x3] }
 0x18b   : > { %v4274_v41 = vpop.permute.xlu1 %3157  ;;  %v4276_v12 = vpop.permute.xlu0 %3172  ;;  %v1039_v60 = vrot.slane %v744_v43, 2  ;;  %v1038_v2 = vsel %vm1000_vm5, %v1036_v38, %v1037_v25  ;;  %v1378_v43 = vrot.slane %v770_v57, 2  ;;  %v1076_v38 = vrot.slane %v4299_v10, 2 }
 0x18c   : > { %5286 = vst [vmem:[#allocation11_spill] sm:$0xff] %v4276_v12  ;;  %2932 = vmatprep.mubr.msk.bf16.mxu1 %vm2084_vm14, %v2041_v56  ;;  %v861_v32 = vsel %vm823_vm6, %v859_v45, %v860_v19  ;;  %v900_v45 = vrot.slane %v4301_v13, 1 }
 0x18d   : > { %3462 = vrot.lane.b32.xlu1 %v3451_v29, %s3735_s10  ;;  %3447 = vrot.lane.b32.xlu0 %v3436_v63, %s3739_s16  ;;  %v747_v63 = vld [vmem:[#allocation2 + $0xd0] sm:$0x3] }
 0x18e   : > { %v867_v22 = vrot.slane %v747_v63, 1  ;;  %v1044_v44 = vrot.slane %v747_v63, 2 }
 0x18f   : > { %v4283_v37 = vpop.permute.xlu1 %3162  ;;  %v4285_v30 = vpop.permute.xlu0 %3182 }
 0x190   : > { %v868_v35 = vsel %vm823_vm6, %v865_v17, %v867_v22  ;;  %v1045_v56 = vsel %vm1000_vm5, %v1042_v36, %v1044_v44 }
 0x191   : > { %3467 = vrot.lane.b32.xlu1 %v3466_v20, %s3734_s9  ;;  %3457 = vrot.lane.b32.xlu0 %v3466_v20, %s3741_s18  ;;  %v3506_v9 = vpack.i.bf16 %v868_v35, %v866_v33  ;;  %v3511_v17 = vpack.i.bf16 %v1045_v56, %v1043_v52  ;;  %v863_v33 = vsel %vm823_vm6, %v860_v19, %v862_v50  ;;  %v899_v52 = vrot.slane %v4299_v10, 1 }
 0x192   : > { %v1040_v35 = vsel %vm1000_vm5, %v1037_v25, %v1039_v60  ;;  %v902_v50 = vrot.slane %v768_v5, 1  ;;  %v1077_v25 = vrot.slane %v4301_v13, 2  ;;  %v1079_v60 = vrot.slane %v768_v5, 2 }
 0x193   : > { %v4289_v61 = vpop.permute.xlu1 %3177  ;;  %v4291_v62 = vpop.permute.xlu0 %3192  ;;  %v4344_v42 = vpack.i.bf16 %v863_v33, %v861_v32  ;;  %v4346_v39 = vpack.i.bf16 %v1040_v35, %v1038_v2  ;;  %v4362_v2 = vld [vmem:[#allocation2 + $0x198] sm:$0xff] }
 0x194   : > { %5287 = vst [vmem:[#allocation12_spill] sm:$0xff] %v4289_v61  ;;  %v1080_v5 = vsel %vm1000_vm5, %v1077_v25, %v1079_v60  ;;  %v1577_v35 = vrot.slane %v4362_v2, 1  ;;  %v3134_v60 = vunpack.i.l.bf16 %v4229_v51 }
 0x195   : > { %3482 = vrot.lane.b32.xlu1 %v3481_v0, %s3737_s14  ;;  %3472 = vrot.lane.b32.xlu0 %v3451_v29, %s3738_s15  ;;  %v4311_v29 = vpack.i.bf16 %v4301_v13, %v4299_v10  ;;  %v4356_v13 = vld [vmem:[#allocation2 + $0x1a8] sm:$0x3] }
 0x197   : > { %v4295_v54 = vpop.permute.xlu1 %3187  ;;  %v4297_v6 = vpop.permute.xlu0 %3197 }
 0x199   : > { %3492 = vrot.lane.b32.xlu1 %v3491_v7, %s3736_s13  ;;  %3477 = vrot.lane.b32.xlu0 %v3466_v20, %s3739_s16  ;;  %v769_v20 = vld [vmem:[#allocation2 + $0x180] sm:$0xff] }
 0x19a   : > { %v1276_v22 = vrot.slane %v769_v20, 1  ;;  %v1377_v36 = vrot.slane %v769_v20, 2 }
 0x19b   : > { %v4305_v23 = vpop.permute.xlu1 %3207  ;;  %v4307_v28 = vpop.permute.xlu0 %3202 }
 0x19c   : > { %v1379_v11 = vsel %vm1000_vm5, %v1377_v36, %v1378_v43  ;;  %v1580_v36 = vrot.slane %v4356_v13, 1 }
 0x19d   : > { %3502 = vrot.lane.b32.xlu1 %v4311_v29, %s3736_s13  ;;  %3487 = vrot.lane.b32.xlu0 %v3481_v0, %s3736_s13  ;;  %v771_v0 = vld [vmem:[#allocation2 + $0x190] sm:$0x3] }
 0x19e   : > { %v1279_v44 = vrot.slane %v771_v0, 1  ;;  %v1380_v12 = vrot.slane %v771_v0, 2  ;;  %v4349_v0 = vpack.i.bf16 %v770_v57, %v769_v20  ;;  %v901_v20 = vsel %vm823_vm6, %v899_v52, %v900_v45 }
 0x19f   : > { %v4318_v49 = vpop.permute.xlu1 %3217  ;;  %v4320_v55 = vpop.permute.xlu0 %3212 }
 0x1a0   : > { %5288 = vst [vmem:[#allocation13_spill] sm:$0xff] %v4318_v49  ;;  %v1381_v10 = vsel %vm1000_vm5, %v1378_v43, %v1380_v12  ;;  %v3164_v49 = vunpack.i.l.bf16 %v4283_v37 }
 0x1a1   : > { %3507 = vrot.lane.b32.xlu1 %v3506_v9, %s3738_s15  ;;  %3497 = vrot.lane.b32.xlu0 %v3491_v7, %s3737_s14  ;;  %v1277_v7 = vrot.slane %v770_v57, 1  ;;  %v903_v57 = vsel %vm823_vm6, %v900_v45, %v902_v50  ;;  %v3035_v45 = vunpack.i.h.bf16 %v4133_v31  ;;  %v3130_v50 = vunpack.i.h.bf16 %v4218_v26 }
 0x1a2   : > { %v4380_v43 = vpack.i.bf16 %v903_v57, %v901_v20  ;;  %v3045_v20 = vunpack.i.h.bf16 %v4137_v46  ;;  %v3069_v57 = vunpack.i.l.bf16 %v4173_v4 }
 0x1a3   : > { %v4326_v63 = vpop.permute.xlu1 %3222  ;;  %v4328_v16 = vpop.permute.xlu0 %3227  ;;  %v1278_v1 = vsel %vm823_vm6, %v1276_v22, %v1277_v7  ;;  %v1280_v14 = vsel %vm823_vm6, %v1277_v7, %v1279_v44  ;;  %v1078_v22 = vsel %vm1000_vm5, %v1076_v38, %v1077_v25  ;;  %v4376_v44 = vpack.i.bf16 %v1381_v10, %v1379_v11 }
 0x1a4   : > { %5289 = vst [vmem:[#allocation14_spill] sm:$0xff] %v4326_v63  ;;  %v4374_v7 = vpack.i.bf16 %v1280_v14, %v1278_v1  ;;  %v4382_v52 = vpack.i.bf16 %v1080_v5, %v1078_v22  ;;  %v3129_v38 = vunpack.i.l.bf16 %v4218_v26  ;;  %v3034_v1 = vunpack.i.l.bf16 %v4133_v31 }
 0x1a5   : > { %3512 = vrot.lane.b32.xlu1 %v3511_v17, %s3739_s16  ;;  %3517 = vrot.lane.b32.xlu0 %v3506_v9, %s3740_s17  ;;  %v3044_v26 = vunpack.i.l.bf16 %v4137_v46  ;;  %v3075_v31 = vunpack.i.h.bf16 %v4161_v58  ;;  %v3074_v5 = vunpack.i.l.bf16 %v4161_v58  ;;  %v3681_v46 = vld [vmem:[#allocation2 + $0x20] sm:$0xff] }
 0x1a6   : > { %v1782_v11 = vsel %vm646_vm2, %v3681_v46, %v3130_v50  ;;  %v1781_v53 = vsel %vm646_vm2, %v3682_v59, %v3129_v38  ;;  %v3095_v59 = vunpack.i.h.bf16 %v4179_v8 }
 0x1a7   : > { %v4338_v56 = vpop.permute.xlu1 %3237  ;;  %v4340_v19 = vpop.permute.xlu0 %3232  ;;  %v1813_v58 = vsel %vm400_vm1, %v1781_v53, %v3134_v60  ;;  %v3079_v53 = vunpack.i.l.bf16 %v4171_v3  ;;  %v3684_v60 = vld [vmem:[#allocation2 + $0x38] sm:$0xff] }
 0x1a8   : > { %5290 = vst [vmem:[#allocation15_spill] sm:$0xff] %v4338_v56  ;;  %v3683_v56 = vld [vmem:[#allocation2 + $0x30] sm:$0xff] }
 0x1a9   : > { %3527 = vrot.lane.b32.xlu1 %v3506_v9, %s3735_s10  ;;  %3522 = vrot.lane.b32.xlu0 %v3511_v17, %s3741_s18  ;;  %v4364_v9 = vld [vmem:[#allocation2 + $0x1a0] sm:$0xff]  ;;  %v1783_v50 = vsel %vm646_vm2, %v3683_v56, %v3069_v57  ;;  %v3686_v57 = vld [vmem:[#allocation2 + $0xd8] sm:$0xff] }
 0x1aa   : > { %v1578_v12 = vrot.slane %v4364_v9, 1 }
 0x1ab   : > { %v4358_v32 = vpop.permute.xlu1 %3247  ;;  %v4360_v33 = vpop.permute.xlu0 %3242 }
 0x1ac   : > { %5291 = vst [vmem:[#allocation16_spill] sm:$0xff] %v4360_v33  ;;  %v4397_v10 = vsel %vm823_vm6, %v1577_v35, %v1578_v12  ;;  %v4405_v22 = vsel %vm823_vm6, %v1578_v12, %v1580_v36  ;;  %v3094_v35 = vunpack.i.l.bf16 %v4179_v8  ;;  %v3160_v12 = vunpack.i.h.bf16 %v4274_v41 }
 0x1ad   : > { %3537 = vrot.lane.b32.xlu1 %v4344_v42, %s3740_s17  ;;  %3532 = vrot.lane.b32.xlu0 %v3511_v17, %s3734_s9  ;;  %v3135_v17 = vunpack.i.h.bf16 %v4229_v51  ;;  %v3070_v51 = vunpack.i.h.bf16 %v4173_v4  ;;  %v3159_v36 = vunpack.i.l.bf16 %v4274_v41  ;;  %v3165_v33 = vunpack.i.h.bf16 %v4283_v37  ;;  %v3685_v37 = vld [vmem:[#allocation2 + $0xe0] sm:$0xff] }
 0x1ae   : > { %v3080_v41 = vunpack.i.h.bf16 %v4171_v3  ;;  %v1846_v8 = vsel %vm1843_vm8, %v1813_v58, %v3034_v1  ;;  %v1798_v56 = vsel %vm646_vm2, %v3685_v37, %v3160_v12  ;;  %v3100_v1 = vunpack.i.h.bf16 %v4193_v15 }
 0x1af   : > { %v4387_v25 = vpop.permute.xlu1 %3252  ;;  %v4389_v14 = vpop.permute.xlu0 %3257  ;;  %v1814_v4 = vsel %vm400_vm1, %v1782_v11, %v3135_v17  ;;  %v1784_v11 = vsel %vm646_vm2, %v3684_v60, %v3070_v51  ;;  %v4431_v17 = vsel %vm400_vm1, %v1783_v50, %v3094_v35  ;;  %v1797_v61 = vsel %vm646_vm2, %v3686_v57, %v3159_v36 }
 0x1b0   : > { %v1829_v51 = vsel %vm400_vm1, %v1797_v61, %v3164_v49  ;;  %v1830_v35 = vsel %vm400_vm1, %v1798_v56, %v3165_v33  ;;  %v1879_v36 = vsel %vm1876_vm9, %v1846_v8, %v3074_v5  ;;  %v3200_v33 = vunpack.i.h.bf16 %v4297_v6 }
 0x1b1   : > { %3547 = vrot.lane.b32.xlu1 %v4344_v42, %s3735_s10  ;;  %3542 = vrot.lane.b32.xlu0 %v4346_v39, %s3741_s18  ;;  %v3099_v58 = vunpack.i.l.bf16 %v4193_v15  ;;  %v3209_v37 = vunpack.i.l.bf16 %v4305_v23 }
 0x1b3   : > { %v3268_v47 = vpop.permute.xlu1 %3267  ;;  %v4417_v63 = vpop.permute.xlu0 %3262 }
 0x1b4   : > { %5292 = vst [vmem:[#allocation17_spill] sm:$0xff] %v4417_v63  ;;  %v3270_v38 = vunpack.i.h.bf16 %v3268_v47  ;;  %v3269_v46 = vunpack.i.l.bf16 %v3268_v47  ;;  %v1847_v47 = vsel %vm1843_vm8, %v1814_v4, %v3035_v45  ;;  %v3105_v4 = vunpack.i.h.bf16 %v4203_v27 }
 0x1b5   : > { %3552 = vrot.lane.b32.xlu1 %v4346_v39, %s3734_s9  ;;  %3557 = vrot.lane.b32.xlu0 %v4344_v42, %s3738_s15  ;;  %v1816_v42 = vsel %vm400_vm1, %v1784_v11, %v3095_v59  ;;  %v1880_v61 = vsel %vm1876_vm9, %v1847_v47, %v3075_v31  ;;  %v3104_v59 = vunpack.i.l.bf16 %v4203_v27  ;;  %v3210_v47 = vunpack.i.h.bf16 %v4305_v23 }
 0x1b6   : > { %v1804_v45 = vsel %vm646_vm2, %v4032_v21, %v3270_v38  ;;  %v1803_v12 = vsel %vm646_vm2, %v4030_v18, %v3269_v46  ;;  %v1862_v21 = vsel %vm1843_vm8, %v1829_v51, %v3044_v26  ;;  %v1863_v18 = vsel %vm1843_vm8, %v1830_v35, %v3045_v20 }
 0x1b7   : > { %v4439_v3 = vpop.permute.xlu1 %3287  ;;  %v3273_v63 = vpop.permute.xlu0 %3272  ;;  %v3120_v38 = vunpack.i.h.bf16 %v4216_v40  ;;  %v1912_v26 = vsel %vm1909_vm10, %v1879_v36, %v3079_v53  ;;  %v1913_v11 = vsel %vm1909_vm10, %v1880_v61, %v3080_v41  ;;  %v1895_v15 = vsel %vm1876_vm9, %v1862_v21, %v3099_v58 }
 0x1b8   : > { %v3275_v50 = vunpack.i.h.bf16 %v3273_v63  ;;  %v3274_v60 = vunpack.i.l.bf16 %v3273_v63  ;;  %v1896_v8 = vsel %vm1876_vm9, %v1863_v18, %v3100_v1  ;;  %v1946_v53 = vsel %vm1942_vm11, %v1913_v11, %v3200_v33 }
 0x1b9   : > { %3572 = vrot.lane.b32.xlu1 %v4042_v24, %s3735_s10  ;;  %3562 = vrot.lane.b32.xlu0 %v4346_v39, %s3739_s16  ;;  %v3199_v24 = vunpack.i.l.bf16 %v4297_v6  ;;  %v3119_v39 = vunpack.i.l.bf16 %v4216_v40  ;;  %v3185_v6 = vunpack.i.h.bf16 %v4285_v30  ;;  %v3205_v41 = vunpack.i.h.bf16 %v4307_v28 }
 0x1ba   : > { %v4454_v49 = vsel %vm400_vm1, %v1804_v45, %v3275_v50  ;;  %v4457_v63 = vsel %vm400_vm1, %v1803_v12, %v3274_v60  ;;  %v3204_v51 = vunpack.i.l.bf16 %v4307_v28  ;;  %v3184_v60 = vunpack.i.l.bf16 %v4285_v30 }
 0x1bb   : > { %v4465_v5 = vpop.permute.xlu1 %3292  ;;  %v3278_v31 = vpop.permute.xlu0 %3277  ;;  %v1945_v27 = vsel %vm1942_vm11, %v1912_v26, %v3199_v24  ;;  %v1928_v1 = vsel %vm1909_vm10, %v1895_v15, %v3104_v59  ;;  %v3190_v23 = vunpack.i.h.bf16 %v4295_v54  ;;  %v1929_v36 = vsel %vm1909_vm10, %v1896_v8, %v3105_v4 }
 0x1bc   : > { %v3280_v20 = vunpack.i.h.bf16 %v3278_v31  ;;  %v3279_v46 = vunpack.i.l.bf16 %v3278_v31  ;;  %v3189_v21 = vunpack.i.l.bf16 %v4295_v54  ;;  %v1961_v18 = vsel %vm1942_vm11, %v1928_v1, %v3209_v37  ;;  %v3688_v1 = vld [vmem:[#allocation2 + $0x108] sm:$0xff] }
 0x1bd   : > { %3587 = vrot.lane.b32.xlu1 %v4349_v0, %s3737_s14  ;;  %3567 = vrot.lane.b32.xlu0 %v4068_v48, %s3741_s18  ;;  %v1962_v33 = vsel %vm1942_vm11, %v1929_v36, %v3210_v47  ;;  %v1849_v59 = vsel %vm1843_vm8, %v1816_v42, %v3205_v41  ;;  %v1848_v4 = vsel %vm1843_vm8, %v4431_v17, %v3204_v51  ;;  %v3230_v26 = vunpack.i.h.bf16 %v4328_v16 }
 0x1be   : > { %v1978_v45 = vsel %vm1975_vm12, %v1945_v27, %v3279_v46  ;;  %v1979_v12 = vsel %vm1975_vm12, %v1946_v53, %v3280_v20  ;;  %v3229_v20 = vunpack.i.l.bf16 %v4328_v16  ;;  %v3235_v15 = vunpack.i.h.bf16 %v4340_v19 }
 0x1bf   : > { %v4485_v56 = vpop.permute.xlu1 %3307  ;;  %v3283_v57 = vpop.permute.xlu0 %3282  ;;  %v3234_v42 = vunpack.i.l.bf16 %v4340_v19  ;;  %v3250_v8 = vunpack.i.h.bf16 %v4358_v32  ;;  %v3249_v17 = vunpack.i.l.bf16 %v4358_v32  ;;  %v3255_v16 = vunpack.i.h.bf16 %v4387_v25 }
 0x1c0   : > { %v3285_v35 = vunpack.i.h.bf16 %v3283_v57  ;;  %v3284_v50 = vunpack.i.l.bf16 %v3283_v57  ;;  %v3254_v27 = vunpack.i.l.bf16 %v4387_v25  ;;  %v3310_v53 = vunpack.i.h.bf16 %v4485_v56 }
 0x1c1   : > { %3592 = vrot.lane.b32.xlu1 %v4374_v7, %s3738_s15  ;;  %3577 = vrot.lane.b32.xlu0 %v4068_v48, %s3734_s9  ;;  %v3309_v47 = vunpack.i.l.bf16 %v4485_v56  ;;  %v5293_v56 = vpack.i.bf16 %v4364_v9, %v4362_v2  ;;  %v1678_v40 = vrot.slane %v4362_v2, 2 }
 0x1c2   : > { %v2011_v61 = vsel %vm2008_vm13, %v1978_v45, %v3284_v50  ;;  %v2012_v28 = vsel %vm2008_vm13, %v1979_v12, %v3285_v35  ;;  %v3687_v50 = vld [vmem:[#allocation2 + $0x110] sm:$0xff] }
 0x1c3   : > { %v2042_v24 = vpack.c.bf16 %v2012_v28, %v2011_v61  ;;  %v3318_v31 = vpop.permute.xlu1 %3317  ;;  %v3298_v58 = vpop.permute.xlu0 %3297 }
 0x1c4   : > { %v3320_v46 = vunpack.i.h.bf16 %v3318_v31  ;;  %v3319_v48 = vunpack.i.l.bf16 %v3318_v31  ;;  %v3300_v11 = vunpack.i.h.bf16 %v3298_v58  ;;  %v3299_v54 = vunpack.i.l.bf16 %v3298_v58 }
 0x1c5   : > { %3597 = vrot.lane.b32.xlu1 %v4376_v44, %s3739_s16  ;;  %2933 = vmatmul.mubr.msk.bf16.vlgmr.msra.gmra.mxu1 %vm2084_vm14, %v2042_v24 }
 0x1c6   : > { %3582 = vrot.lane.b32.xlu0 %v4311_v29, %s3737_s14  ;;  %v1802_v32 = vsel %vm646_vm2, %v3687_v50, %v3320_v46  ;;  %v1801_v29 = vsel %vm646_vm2, %v3688_v1, %v3319_v48  ;;  %v1881_v45 = vsel %vm1876_vm9, %v1848_v4, %v3299_v54  ;;  %v1882_v25 = vsel %vm1876_vm9, %v1849_v59, %v3300_v11 }
 0x1c7   : > { %v3323_v37 = vpop.permute.xlu1 %3322  ;;  %v3303_v57 = vpop.permute.xlu0 %3302  ;;  %v1994_v48 = vsel %vm1975_vm12, %v1961_v18, %v3309_v47  ;;  %v1995_v11 = vsel %vm1975_vm12, %v1962_v33, %v3310_v53  ;;  %v3636_v1 = vpack.i.bf16 %v4405_v22, %v4397_v10 }
 0x1c8   : > { %v3325_v41 = vunpack.i.h.bf16 %v3323_v37  ;;  %v3324_v51 = vunpack.i.l.bf16 %v3323_v37  ;;  %v3305_v19 = vunpack.i.h.bf16 %v3303_v57  ;;  %v3304_v35 = vunpack.i.l.bf16 %v3303_v57  ;;  %v3689_v57 = vld [vmem:[#allocation2 + $0xf8] sm:$0xff] }
 0x1c9   : > { %3607 = vrot.lane.b32.xlu1 %v5293_v56, %s3736_s13 }
 0x1ca   : > { %v1833_v12 = vsel %vm400_vm1, %v1801_v29, %v3324_v51  ;;  %v1834_v36 = vsel %vm400_vm1, %v1802_v32, %v3325_v41  ;;  %v1914_v61 = vsel %vm1909_vm10, %v1881_v45, %v3304_v35  ;;  %v1915_v28 = vsel %vm1909_vm10, %v1882_v25, %v3305_v19  ;;  %3602 = vrot.lane.b32.xlu0 %v4349_v0, %s3736_s13  ;;  %v3690_v41 = vld [vmem:[#allocation2 + $0xf0] sm:$0xff] }
 0x1cb   : > { %v1866_v24 = vsel %vm1843_vm8, %v1833_v12, %v3189_v21  ;;  %v1867_v31 = vsel %vm1843_vm8, %v1834_v36, %v3190_v23  ;;  %v1947_v58 = vsel %vm1942_vm11, %v1914_v61, %v3184_v60  ;;  %v1948_v59 = vsel %vm1942_vm11, %v1915_v28, %v3185_v6  ;;  %v4542_v4 = vpop.permute.xlu1 %3337  ;;  %v3313_v46 = vpop.permute.xlu0 %3312 }
 0x1cc   : > { %v3315_v54 = vunpack.i.h.bf16 %v3313_v46  ;;  %v3314_v37 = vunpack.i.l.bf16 %v3313_v46  ;;  %v1980_v0 = vsel %vm1975_vm12, %v1947_v58, %v3229_v20  ;;  %v1981_v60 = vsel %vm1975_vm12, %v1948_v59, %v3230_v26  ;;  %v5294_v46 = vld [vmem:[#allocation17_spill] sm:$0xff] }
 0x1cd   : > { %3617 = vrot.lane.b32.xlu1 %v4380_v43, %s3740_s17  ;;  %v1899_v30 = vsel %vm1876_vm9, %v1866_v24, %v3249_v17  ;;  %v1900_v6 = vsel %vm1876_vm9, %v1867_v31, %v3250_v8  ;;  %v2013_v18 = vsel %vm2008_vm13, %v1980_v0, %v3234_v42  ;;  %v2014_v33 = vsel %vm2008_vm13, %v1981_v60, %v3235_v15 }
 0x1ce   : > { %v4553_v23 = vsel %vm2008_vm13, %v1995_v11, %v3315_v54  ;;  %v4556_v21 = vsel %vm2008_vm13, %v1994_v48, %v3314_v37  ;;  %3612 = vrot.lane.b32.xlu0 %v4374_v7, %s3740_s17  ;;  %v2043_v8 = vpack.c.bf16 %v2014_v33, %v2013_v18  ;;  %v1932_v53 = vsel %vm1909_vm10, %v1899_v30, %v3254_v27 }
 0x1cf   : > { %v4564_v20 = vpop.permute.xlu1 %3347  ;;  %v3328_v17 = vpop.permute.xlu0 %3327  ;;  %v1933_v47 = vsel %vm1909_vm10, %v1900_v6, %v3255_v16  ;;  %v1800_v7 = vsel %vm646_vm2, %v3689_v57, %v3120_v38  ;;  %v1799_v15 = vsel %vm646_vm2, %v3690_v41, %v3119_v39  ;;  %v3215_v42 = vunpack.i.h.bf16 %v4320_v55  ;;  %v3692_v57 = vld [vmem:[%s3799_s8] sm:$0xff]  }
 0x1d0   : > { %v3214_v51 = vunpack.i.l.bf16 %v4320_v55  ;;  %v3125_v19 = vunpack.i.h.bf16 %v4201_v34  ;;  %v3124_v27 = vunpack.i.l.bf16 %v4201_v34  ;;  %v3330_v35 = vunpack.i.h.bf16 %v3328_v17  ;;  %2936 = vmatprep.mubr.msk.bf16.mxu1 %vm2084_vm14, %v2043_v8 }
 0x1d1   : > { %v3329_v16 = vunpack.i.l.bf16 %v3328_v17  ;;  %3627 = vrot.lane.b32.xlu1 %v4380_v43, %s3735_s10  ;;  %v1679_v38 = vrot.slane %v4364_v9, 2  ;;  %v1681_v55 = vrot.slane %v4356_v13, 2  ;;  %v3195_v25 = vunpack.i.h.bf16 %v4291_v62 }
 0x1d2   : > { %3622 = vrot.lane.b32.xlu0 %v4382_v52, %s3741_s18  ;;  %v1831_v39 = vsel %vm400_vm1, %v1799_v15, %v3124_v27  ;;  %v1832_v34 = vsel %vm400_vm1, %v1800_v7, %v3125_v19  ;;  %v3194_v13 = vunpack.i.l.bf16 %v4291_v62  ;;  %v3260_v62 = vunpack.i.h.bf16 %v4389_v14 }
 0x1d3   : > { %v4588_v50 = vpop.permute.xlu1 %3357  ;;  %v3333_v32 = vpop.permute.xlu0 %3332  ;;  %v1865_v29 = vsel %vm1843_vm8, %v1832_v34, %v3215_v42  ;;  %v1864_v9 = vsel %vm1843_vm8, %v1831_v39, %v3214_v51  ;;  %v1680_v22 = vsel %vm1000_vm5, %v1678_v40, %v1679_v38  ;;  %v1682_v61 = vsel %vm1000_vm5, %v1679_v38, %v1681_v55  ;;  %v3693_v51 = vld [vmem:[%s3799_s8 + $0x18] sm:$0xff]  }
 0x1d4   : > { %v3335_v2 = vunpack.i.h.bf16 %v3333_v32  ;;  %v3334_v45 = vunpack.i.l.bf16 %v3333_v32  ;;  %v1897_v56 = vsel %vm1876_vm9, %v1864_v9, %v3329_v16  ;;  %v1898_v12 = vsel %vm1876_vm9, %v1865_v29, %v3330_v35  ;;  %v3694_v16 = vld [vmem:[%s3799_s8 + $0x10] sm:$0xff]  }
 0x1d5   : > { %3632 = vrot.lane.b32.xlu1 %v4382_v52, %s3734_s9  ;;  %v3259_v28 = vunpack.i.l.bf16 %v4389_v14  ;;  %v3265_v48 = vunpack.i.h.bf16 %v5294_v46  ;;  %v3264_v11 = vunpack.i.l.bf16 %v5294_v46  ;;  %v3656_v37 = vpack.i.bf16 %v1682_v61, %v1680_v22  ;;  %v3700_v61 = vld [vmem:[%s3799_s8 + $0x30] sm:$0xff]  }
 0x1d6   : > { %v1930_v36 = vsel %vm1909_vm10, %v1897_v56, %v3334_v45  ;;  %v1931_v10 = vsel %vm1909_vm10, %v1898_v12, %v3335_v2  ;;  %3642 = vrot.lane.b32.xlu0 %v4380_v43, %s3738_s15  ;;  %v3289_v19 = vunpack.i.l.bf16 %v4439_v3  ;;  %v3295_v38 = vunpack.i.h.bf16 %v4465_v5  ;;  %v5295_v45 = vld [vmem:[#allocation12_spill] sm:$0xff]  ;;  %v5296_v12 = vld [vmem:[#allocation15_spill] sm:$0xff] }
 0x1d7   : > { %v1963_v24 = vsel %vm1942_vm11, %v1930_v36, %v3194_v13  ;;  %v1964_v31 = vsel %vm1942_vm11, %v1931_v10, %v3195_v25  ;;  %v3368_v58 = vpop.permute.xlu1 %3367  ;;  %v4610_v59 = vpop.permute.xlu0 %3342  ;;  %v3294_v40 = vunpack.i.l.bf16 %v4465_v5  ;;  %v3180_v25 = vunpack.i.h.bf16 %v5295_v45  ;;  %v3699_v56 = vld [vmem:[%s3799_s8 + $0x38] sm:$0xff]  }
 0x1d8   : > { %v3370_v43 = vunpack.i.h.bf16 %v3368_v58  ;;  %v3369_v54 = vunpack.i.l.bf16 %v3368_v58  ;;  %v1996_v0 = vsel %vm1975_vm12, %v1963_v24, %v3259_v28  ;;  %v1997_v14 = vsel %vm1975_vm12, %v1964_v31, %v3260_v62  ;;  %v5297_v62 = vld [vmem:[#allocation13_spill] sm:$0xff]  ;;  %v5298_v58 = vld [vmem:[#allocation16_spill] sm:$0xff] }
 0x1d9   : > { %3637 = vrot.lane.b32.xlu1 %v3636_v1, %s3740_s17  ;;  %v4626_v6 = vsel %vm2008_vm13, %v1996_v0, %v3264_v11  ;;  %v4629_v18 = vsel %vm2008_vm13, %v1997_v14, %v3265_v48  ;;  %v3698_v1 = vld [vmem:[%s3799_s8 + $0x20] sm:$0xff]   ;;  %v3179_v13 = vunpack.i.l.bf16 %v5295_v45  ;;  %v3240_v36 = vunpack.i.h.bf16 %v5296_v12  ;;  %v3701_v0 = vld [vmem:[%s3799_s8 + $0x48] sm:$0xff]  }
 0x1da   : > { %v4618_v60 = vsel %vm1942_vm11, %v1932_v53, %v3369_v54  ;;  %v4621_v30 = vsel %vm1942_vm11, %v1933_v47, %v3370_v43  ;;  %3647 = vrot.lane.b32.xlu0 %v4382_v52, %s3739_s16  ;;  %v3691_v47 = vld [vmem:[%s3799_s8 + $0x8] sm:$0xff]   ;;  %v3220_v28 = vunpack.i.h.bf16 %v5297_v62  ;;  %v3219_v24 = vunpack.i.l.bf16 %v5297_v62 }
 0x1db   : > { %v4631_v33 = vpop.permute.xlu1 %3377  ;;  %v4633_v17 = vpop.permute.xlu0 %3352  ;;  %v3239_v31 = vunpack.i.l.bf16 %v5296_v12  ;;  %v3245_v46 = vunpack.i.h.bf16 %v5298_v58  ;;  %v3244_v43 = vunpack.i.l.bf16 %v5298_v58  ;;  %v5299_v14 = vld [vmem:[#allocation14_spill] sm:$0xff] }
 0x1dd   : > { %3657 = vrot.lane.b32.xlu1 %v3656_v37, %s3741_s18 }
 0x1de   : > { %3652 = vrot.lane.b32.xlu0 %v4376_v44, %s3741_s18  ;;  %v3290_v44 = vunpack.i.h.bf16 %v4439_v3  ;;  %v3695_v3 = vld [vmem:[%s3799_s8 + $0x28] sm:$0xff]  }
 0x1df   : > { %v4640_v52 = vpop.permute.xlu1 %3382  ;;  %v4642_v53 = vpop.permute.xlu0 %3362 }
 0x1e0   : > { %v3365_v62 = vunpack.i.h.bf16 %v4642_v53 }
 0x1e1   : > { %2348 = vrot.lane.b32.xlu1 %v3691_v47, %s3735_s10  ;;  %v3225_v47 = vunpack.i.h.bf16 %v5299_v14 }
 0x1e2   : > { %2346 = vrot.lane.b32.xlu0 %v3692_v57, %s3735_s10  ;;  %v3224_v57 = vunpack.i.l.bf16 %v5299_v14 }
 0x1e3   : > { %v4648_v7 = vpop.permute.xlu1 %3397  ;;  %v3373_v41 = vpop.permute.xlu0 %3372 }
 0x1e4   : > { %v3375_v15 = vunpack.i.h.bf16 %v3373_v41  ;;  %v3374_v42 = vunpack.i.l.bf16 %v3373_v41  ;;  %v3702_v41 = vld [vmem:[#allocation2 + $0x68] sm:$0xff] }
 0x1e5   : > { %2352 = vrot.lane.b32.xlu1 %v3693_v51, %s3735_s10  ;;  %v3703_v51 = vld [vmem:[%s3799_s8 + $0x40] sm:$0xff]  }
 0x1e6   : > { %v4656_v27 = vsel %vm1843_vm8, %v4457_v63, %v3374_v42  ;;  %v4660_v35 = vsel %vm1843_vm8, %v4454_v49, %v3375_v15  ;;  %2350 = vrot.lane.b32.xlu0 %v3694_v16, %s3735_s10  ;;  %v3696_v63 = vld [vmem:[#allocation2 + $0x50] sm:$0xff]  ;;  %v3697_v49 = vld [vmem:[#allocation2 + $0x48] sm:$0xff]  ;;  %v1788_v15 = vsel %vm646_vm2, %v3702_v41, %v3240_v36  ;;  %v3359_v42 = vunpack.i.l.bf16 %v4588_v50 }
 0x1e7   : > { %v4666_v55 = vpop.permute.xlu1 %3407  ;;  %v4668_v39 = vpop.permute.xlu0 %3387  ;;  %v1786_v34 = vsel %vm646_vm2, %v3696_v63, %v3290_v44  ;;  %v1785_v32 = vsel %vm646_vm2, %v3697_v49, %v3289_v19  ;;  %v3704_v44 = vld [vmem:[#allocation2 + $0x60] sm:$0xff]  ;;  %v4710_v16 = vsel %vm400_vm1, %v1788_v15, %v3245_v46  ;;  %v3706_v36 = vld [vmem:[%s3799_s8 + $0x50] sm:$0xff]  }
 0x1e8   : > { %v1817_v5 = vsel %vm400_vm1, %v1785_v32, %v3294_v40  ;;  %v1818_v29 = vsel %vm400_vm1, %v1786_v34, %v3295_v38  ;;  %v1787_v19 = vsel %vm646_vm2, %v3704_v44, %v3239_v31  ;;  %v3360_v38 = vunpack.i.h.bf16 %v4588_v50 }
 0x1e9   : > { %2356 = vrot.lane.b32.xlu1 %v3695_v3, %s3735_s10  ;;  %v1850_v10 = vsel %vm1843_vm8, %v1817_v5, %v3179_v13  ;;  %v1851_v22 = vsel %vm1843_vm8, %v1818_v29, %v3180_v25  ;;  %v4716_v63 = vsel %vm400_vm1, %v1787_v19, %v3244_v43  ;;  %v3340_v34 = vunpack.i.h.bf16 %v4542_v4  ;;  %v3705_v25 = vld [vmem:[%s3799_s8 + $0x58] sm:$0xff]  }
 0x1ea   : > { %2354 = vrot.lane.b32.xlu0 %v3698_v1, %s3735_s10  ;;  %v1883_v54 = vsel %vm1876_vm9, %v1850_v10, %v3219_v24  ;;  %v1884_v37 = vsel %vm1876_vm9, %v1851_v22, %v3220_v28  ;;  %v3339_v50 = vunpack.i.l.bf16 %v4542_v4  ;;  %v3350_v13 = vunpack.i.h.bf16 %v4564_v20 }
 0x1eb   : > { %v4678_v9 = vpop.permute.xlu1 %3412  ;;  %v4680_v2 = vpop.permute.xlu0 %3392  ;;  %v1916_v49 = vsel %vm1909_vm10, %v1883_v54, %v3224_v57  ;;  %v1917_v32 = vsel %vm1909_vm10, %v1884_v37, %v3225_v47  ;;  %v3380_v22 = vunpack.i.h.bf16 %v4631_v33  ;;  %v3707_v54 = vld [vmem:[#allocation2 + $0x80] sm:$0xff] }
 0x1ec   : > { %v1949_v12 = vsel %vm1942_vm11, %v1916_v49, %v3359_v42  ;;  %v1950_v10 = vsel %vm1942_vm11, %v1917_v32, %v3360_v38  ;;  %v3710_v42 = vld [vmem:[%s3799_s8 + $0x60] sm:$0xff]   ;;  %v3345_v32 = vunpack.i.h.bf16 %v4610_v59 }
 0x1ed   : > { %2360 = vrot.lane.b32.xlu1 %v3699_v56, %s3735_s10  ;;  %v3349_v56 = vunpack.i.l.bf16 %v4564_v20 }
 0x1ee   : > { %2358 = vrot.lane.b32.xlu0 %v3700_v61, %s3735_s10  ;;  %v3379_v61 = vunpack.i.l.bf16 %v4631_v33  ;;  %v3709_v33 = vld [vmem:[%s3799_s8 + $0x68] sm:$0xff]  }
 0x1ef   : > { %v3423_v48 = vpop.permute.xlu1 %3422  ;;  %v4695_v11 = vpop.permute.xlu0 %3402 }
 0x1f0   : > { %v3425_v1 = vunpack.i.h.bf16 %v3423_v48  ;;  %v3424_v5 = vunpack.i.l.bf16 %v3423_v48 }
 0x1f1   : > { %2364 = vrot.lane.b32.xlu1 %v3701_v0, %s3735_s10  ;;  %v3708_v0 = vld [vmem:[#allocation2 + $0x78] sm:$0xff] }
 0x1f2   : > { %2362 = vrot.lane.b32.xlu0 %v3703_v51, %s3735_s10  ;;  %v1982_v48 = vsel %vm1975_vm12, %v1949_v12, %v3424_v5  ;;  %v1983_v43 = vsel %vm1975_vm12, %v1950_v10, %v3425_v1  ;;  %v3364_v51 = vunpack.i.l.bf16 %v4642_v53  ;;  %v3344_v1 = vunpack.i.l.bf16 %v4610_v59 }
 0x1f3   : > { %v3433_v40 = vpop.permute.xlu1 %3432  ;;  %v4713_v3 = vpop.permute.xlu0 %3417 }
 0x1f4   : > { %v3435_v29 = vunpack.i.h.bf16 %v3433_v40  ;;  %v3434_v45 = vunpack.i.l.bf16 %v3433_v40 }
 0x1f5   : > { %2368 = vrot.lane.b32.xlu1 %v3705_v25, %s3735_s10  ;;  %v3384_v25 = vunpack.i.l.bf16 %v4640_v52 }
 0x1f6   : > { %2366 = vrot.lane.b32.xlu0 %v3706_v36, %s3735_s10  ;;  %v1790_v37 = vsel %vm646_vm2, %v3707_v54, %v3435_v29  ;;  %v1789_v14 = vsel %vm646_vm2, %v3708_v0, %v3434_v45  ;;  %v3385_v45 = vunpack.i.h.bf16 %v4640_v52  ;;  %v1852_v52 = vsel %vm1843_vm8, %v4716_v63, %v3364_v51 }
 0x1f7   : > { %v3438_v28 = vpop.permute.xlu1 %3437  ;;  %v3428_v4 = vpop.permute.xlu0 %3427  ;;  %v3389_v63 = vunpack.i.l.bf16 %v4668_v39  ;;  %v3394_v54 = vunpack.i.l.bf16 %v4680_v2 }
 0x1f8   : > { %v3440_v24 = vunpack.i.h.bf16 %v3438_v28  ;;  %v3439_v31 = vunpack.i.l.bf16 %v3438_v28  ;;  %v3430_v58 = vunpack.i.h.bf16 %v3428_v4  ;;  %v3429_v46 = vunpack.i.l.bf16 %v3428_v4  ;;  %v3712_v28 = vld [vmem:[%s3799_s8 + $0x70] sm:$0xff]  }
 0x1f9   : > { %2372 = vrot.lane.b32.xlu1 %v3709_v33, %s3735_s10  ;;  %v3714_v33 = vld [vmem:[#allocation2 + $0x138] sm:$0xff] }
 0x1fa   : > { %v1821_v47 = vsel %vm400_vm1, %v1789_v14, %v3439_v31  ;;  %v1822_v57 = vsel %vm400_vm1, %v1790_v37, %v3440_v24  ;;  %v2016_v41 = vsel %vm2008_vm13, %v1983_v43, %v3430_v58  ;;  %v2015_v15 = vsel %vm2008_vm13, %v1982_v48, %v3429_v46  ;;  %2370 = vrot.lane.b32.xlu0 %v3710_v42, %s3735_s10  ;;  %v3713_v14 = vld [vmem:[#allocation2 + $0x140] sm:$0xff] }
 0x1fb   : > { %v1854_v44 = vsel %vm1843_vm8, %v1821_v47, %v3339_v50  ;;  %v1855_v19 = vsel %vm1843_vm8, %v1822_v57, %v3340_v34  ;;  %v2044_v38 = vpack.c.bf16 %v2016_v41, %v2015_v15  ;;  %v3453_v40 = vpop.permute.xlu1 %3452  ;;  %v3443_v49 = vpop.permute.xlu0 %3442  ;;  %v3711_v50 = vld [vmem:[%s3799_s8 + $0x78] sm:$0xff]   ;;  %v3409_v24 = vunpack.i.l.bf16 %v4666_v55 }
 0x1fc   : > { %v3455_v5 = vunpack.i.h.bf16 %v3453_v40  ;;  %v3454_v29 = vunpack.i.l.bf16 %v3453_v40  ;;  %v1887_v53 = vsel %vm1876_vm9, %v1854_v44, %v3379_v61  ;;  %v1888_v34 = vsel %vm1876_vm9, %v1855_v19, %v3380_v22 }
 0x1fd   : > { %2937 = vmatmul.mubr.msk.bf16.gmra.mxu1 %vm2084_vm14, %v2044_v38  ;;  %2376 = vrot.lane.b32.xlu1 %v3711_v50, %s3735_s10  ;;  %v3445_v36 = vunpack.i.h.bf16 %v3443_v49  ;;  %v3444_v10 = vunpack.i.l.bf16 %v3443_v49  ;;  %v1853_v22 = vsel %vm1843_vm8, %v4710_v16, %v3365_v62  ;;  %v4768_v4 = vsel %vm1909_vm10, %v1887_v53, %v3384_v25 }
 0x1fe   : > { %v1998_v12 = vsel %vm1975_vm12, %v4618_v60, %v3454_v29  ;;  %v1999_v59 = vsel %vm1975_vm12, %v4621_v30, %v3455_v5  ;;  %2374 = vrot.lane.b32.xlu0 %v3712_v28, %s3735_s10  ;;  %v4771_v60 = vsel %vm1909_vm10, %v1888_v34, %v3385_v45  ;;  %v3410_v30 = vunpack.i.h.bf16 %v4666_v55  ;;  %s2838_s10 = sshll.u32 %s5319_s25, 8 }
 0x1ff   : > { %v3463_v61 = vpop.permute.xlu1 %3462  ;;  %v3448_v46 = vpop.permute.xlu0 %3447  ;;  %v3390_v48 = vunpack.i.h.bf16 %v4668_v39  ;;  %v3395_v62 = vunpack.i.h.bf16 %v4680_v2  ;;  %v1885_v37 = vsel %vm1876_vm9, %v1852_v52, %v3444_v10  ;;  %v1886_v0 = vsel %vm1876_vm9, %v1853_v22, %v3445_v36  ;;  %s5155_s13 = scalar_lea.vmem %s5262_s7, %s2838_s10 }
 0x200   : > { %v3465_v31 = vunpack.i.h.bf16 %v3463_v61  ;;  %v3464_v58 = vunpack.i.l.bf16 %v3463_v61  ;;  %v3450_v43 = vunpack.i.h.bf16 %v3448_v46  ;;  %v3449_v16 = vunpack.i.l.bf16 %v3448_v46 }
 0x201   : > { %v3415_v36 = vunpack.i.h.bf16 %v4678_v9  ;;  %v3414_v10 = vunpack.i.l.bf16 %v4678_v9 }
 0x202   : > { %v1806_v55 = vsel %vm646_vm2, %v3713_v14, %v3465_v31  ;;  %v1805_v47 = vsel %vm646_vm2, %v3714_v33, %v3464_v58  ;;  %v1918_v57 = vsel %vm1909_vm10, %v1885_v37, %v3449_v16  ;;  %v1919_v39 = vsel %vm1909_vm10, %v1886_v0, %v3450_v43 }
 0x203   : > { %v3468_v41 = vpop.permute.xlu1 %3467  ;;  %v1951_v15 = vsel %vm1942_vm11, %v1918_v57, %v3344_v1  ;;  %v1952_v42 = vsel %vm1942_vm11, %v1919_v39, %v3345_v32  ;;  %v3458_v44 = vpop.permute.xlu0 %3457  ;;  %v3420_v43 = vunpack.i.h.bf16 %v4713_v3  ;;  %v3419_v16 = vunpack.i.l.bf16 %v4713_v3  ;;  %v5300_v57 = vld [vmem:[#allocation3_spill] sm:$0xff] }
 0x204   : > { %v3470_v2 = vunpack.i.h.bf16 %v3468_v41  ;;  %v3469_v51 = vunpack.i.l.bf16 %v3468_v41  ;;  %v3460_v19 = vunpack.i.h.bf16 %v3458_v44  ;;  %v3459_v38 = vunpack.i.l.bf16 %v3458_v44  ;;  %v5302_v44 = vld [vmem:[#allocation5_spill] sm:$0xff] }
 0x205   : > { %v1984_v40 = vsel %vm1975_vm12, %v1951_v15, %v3389_v63  ;;  %v1985_v49 = vsel %vm1975_vm12, %v1952_v42, %v3390_v48  ;;  %v3355_v48 = vunpack.i.h.bf16 %v4633_v17  ;;  %v3050_v39 = vunpack.i.h.bf16 %v5300_v57  ;;  %v5301_v15 = vld [vmem:[#allocation4_spill] sm:$0xff] }
 0x206   : > { %v1837_v5 = vsel %vm400_vm1, %v1805_v47, %v3469_v51  ;;  %v1838_v29 = vsel %vm400_vm1, %v1806_v55, %v3470_v2  ;;  %v2017_v45 = vsel %vm2008_vm13, %v1984_v40, %v3394_v54  ;;  %v2018_v25 = vsel %vm2008_vm13, %v1985_v49, %v3395_v62  ;;  %v5303_v40 = vld [vmem:[#allocation6_spill] sm:$0xff] }
 0x207   : > { %v1870_v32 = vsel %vm1843_vm8, %v1837_v5, %v3349_v56  ;;  %v1871_v1 = vsel %vm1843_vm8, %v1838_v29, %v3350_v13  ;;  %v4800_v53 = vsel %vm2008_vm13, %v1999_v59, %v3460_v19  ;;  %v4803_v34 = vsel %vm2008_vm13, %v1998_v12, %v3459_v38  ;;  %v4805_v50 = vpop.permute.xlu1 %3482  ;;  %v3473_v56 = vpop.permute.xlu0 %3472 }
 0x208   : > { %v2045_v52 = vpack.c.bf16 %v2018_v25, %v2017_v45  ;;  %v1903_v20 = vsel %vm1876_vm9, %v1870_v32, %v3409_v24  ;;  %v1904_v13 = vsel %vm1876_vm9, %v1871_v1, %v3410_v30  ;;  %v3475_v59 = vunpack.i.h.bf16 %v3473_v56  ;;  %v5304_v45 = vld [vmem:[#allocation7_spill] sm:$0xff] }
 0x209   : > { %v3474_v22 = vunpack.i.l.bf16 %v3473_v56  ;;  %v4815_v12 = vsel %vm1909_vm10, %v1903_v20, %v3414_v10  ;;  %v4818_v61 = vsel %vm1909_vm10, %v1904_v13, %v3415_v36  ;;  %v3354_v24 = vunpack.i.l.bf16 %v4633_v17  ;;  %v5305_v10 = vld [vmem:[#allocation8_spill] sm:$0xff] }
 0x20a   : > { %2940 = vmatprep.mubr.msk.bf16.mxu1 %vm2084_vm14, %v2045_v52  ;;  %v1902_v63 = vsel %vm1876_vm9, %v4660_v35, %v3475_v59  ;;  %v3049_v41 = vunpack.i.l.bf16 %v5300_v57  ;;  %v3065_v42 = vunpack.i.h.bf16 %v5301_v15  ;;  %v3064_v51 = vunpack.i.l.bf16 %v5301_v15  ;;  %v5306_v59 = vld [vmem:[#allocation9_spill] sm:$0xff] }
 0x20b   : > { %v4820_v9 = vpop.permute.xlu1 %3492  ;;  %v3478_v31 = vpop.permute.xlu0 %3477  ;;  %v1901_v30 = vsel %vm1876_vm9, %v4656_v27, %v3474_v22  ;;  %v3680_v27 = vld [vmem:[%s5258_s3] sm:$0x3f]   ;;  %v3060_v19 = vunpack.i.h.bf16 %v5302_v44  ;;  %v3059_v38 = vunpack.i.l.bf16 %v5302_v44  ;;  %v3110_v49 = vunpack.i.h.bf16 %v5303_v40 }
 0x20c   : > { %v3480_v58 = vunpack.i.h.bf16 %v3478_v31  ;;  %v3479_v46 = vunpack.i.l.bf16 %v3478_v31  ;;  %3003 = vmatprep.subr.msk.bf16.mxu0 %vm1000_vm5, %v3680_v27  ;;  %v2473_v55 = vsel %vm1000_vm5, %v3680_v27, 0  ;;  %v3109_v29 = vunpack.i.l.bf16 %v5303_v40 }
 0x20d   : > { %2965 = vmatpush3.bf16.msra.mxu0 %v2473_v55  ;;  %v3400_v32 = vunpack.i.h.bf16 %v4648_v7  ;;  %v3399_v1 = vunpack.i.l.bf16 %v4648_v7  ;;  %v3405_v52 = vunpack.i.h.bf16 %v4695_v11  ;;  %v3404_v20 = vunpack.i.l.bf16 %v4695_v11 }
 0x20e   : > { %v1934_v62 = vsel %vm1909_vm10, %v1901_v30, %v3479_v46  ;;  %v1935_v54 = vsel %vm1909_vm10, %v1902_v63, %v3480_v58  ;;  %v3150_v22 = vunpack.i.h.bf16 %v5306_v59  ;;  %v3149_v31 = vunpack.i.l.bf16 %v5306_v59  ;;  %v5308_v30 = vld [vmem:[#allocation11_spill] sm:$0xff] }
 0x20f   : > { %v4832_v37 = vpop.permute.xlu1 %3502  ;;  %v1967_v0 = vsel %vm1942_vm11, %v1934_v62, %v3354_v24  ;;  %v1968_v17 = vsel %vm1942_vm11, %v1935_v54, %v3355_v48  ;;  %v4836_v14 = vpop.permute.xlu0 %3487  ;;  %v3494_v58 = vunpack.i.l.bf16 %v4820_v9  ;;  %v5307_v48 = vld [vmem:[#allocation10_spill] sm:$0xff]  ;;  %v3175_v63 = vunpack.i.h.bf16 %v5308_v30  ;;  %v3715_v62 = vld [vmem:[#allocation2 + $0x98] sm:$0xff] }
 0x210   : > { %v4842_v35 = vsel %vm1975_vm12, %v1967_v0, %v3419_v16  ;;  %v4845_v3 = vsel %vm1975_vm12, %v1968_v17, %v3420_v43  ;;  %v3170_v24 = vunpack.i.h.bf16 %v5307_v48  ;;  %v3169_v7 = vunpack.i.l.bf16 %v5307_v48  ;;  %v3716_v0 = vld [vmem:[#allocation2 + $0x90] sm:$0xff] }
 0x211   : > { %v3495_v43 = vunpack.i.h.bf16 %v4820_v9  ;;  %v3174_v11 = vunpack.i.l.bf16 %v5308_v30  ;;  %v1792_v54 = vsel %vm646_vm2, %v3715_v62, %v3400_v32  ;;  %v1791_v17 = vsel %vm646_vm2, %v3716_v0, %v3399_v1 }
 0x212   : > { %v1824_v55 = vsel %vm400_vm1, %v1792_v54, %v3405_v52  ;;  %v1823_v15 = vsel %vm400_vm1, %v1791_v17, %v3404_v20  ;;  %v3485_v8 = vunpack.i.h.bf16 %v4805_v50  ;;  %v3484_v9 = vunpack.i.l.bf16 %v4805_v50 }
 0x213   : > { %v4849_v33 = vpop.permute.xlu1 %3507  ;;  %v3498_v47 = vpop.permute.xlu0 %3497  ;;  %v1953_v30 = vsel %vm1942_vm11, %v4768_v4, %v3494_v58  ;;  %v1954_v32 = vsel %vm1942_vm11, %v4771_v60, %v3495_v43  ;;  %v3717_v4 = vld [vmem:[#allocation2 + $0xc8] sm:$0xff]  ;;  %v3718_v58 = vld [vmem:[#allocation2 + $0xc0] sm:$0xff] }
 0x214   : > { %v3499_v27 = vunpack.i.l.bf16 %v3498_v47  ;;  %v3500_v26 = vunpack.i.h.bf16 %v3498_v47  ;;  %v3510_v20 = vunpack.i.h.bf16 %v4849_v33 }
 0x216   : > { %v4896_v54 = vsel %vm1843_vm8, %v1823_v15, %v3499_v27  ;;  %v1857_v25 = vsel %vm1843_vm8, %v1824_v55, %v3500_v26 }
 0x217   : > { %v4854_v2 = vpop.permute.xlu1 %3512  ;;  %v4860_v5 = vpop.permute.xlu0 %3517 }
 0x218   : > { %v3515_v36 = vunpack.i.h.bf16 %v4854_v2 }
 0x21b   : > { %v3528_v46 = vpop.permute.xlu1 %3527  ;;  %v4878_v16 = vpop.permute.xlu0 %3522 }
 0x21c   : > { %v3530_v48 = vunpack.i.h.bf16 %v3528_v46  ;;  %v3529_v28 = vunpack.i.l.bf16 %v3528_v46  ;;  %v3509_v46 = vunpack.i.l.bf16 %v4849_v33 }
 0x21e   : > { %v1796_v47 = vsel %vm646_vm2, %v3717_v4, %v3530_v48  ;;  %v1795_v60 = vsel %vm646_vm2, %v3718_v58, %v3529_v28 }
 0x21f   : > { %v3538_v56 = vpop.permute.xlu1 %3537  ;;  %v3533_v62 = vpop.permute.xlu0 %3532 }
 0x220   : > { %v3535_v0 = vunpack.i.h.bf16 %v3533_v62  ;;  %v3534_v17 = vunpack.i.l.bf16 %v3533_v62  ;;  %v3540_v43 = vunpack.i.h.bf16 %v3538_v56  ;;  %v3539_v13 = vunpack.i.l.bf16 %v3538_v56 }
 0x222   : > { %v1828_v1 = vsel %vm400_vm1, %v1796_v47, %v3535_v0  ;;  %v1827_v33 = vsel %vm400_vm1, %v1795_v60, %v3534_v17  ;;  %v1986_v55 = vsel %vm1975_vm12, %v1953_v30, %v3539_v13  ;;  %v1987_v0 = vsel %vm1975_vm12, %v1954_v32, %v3540_v43  ;;  %v3719_v32 = vld [vmem:[#allocation2 + $0xb0] sm:$0xff]  ;;  %v3720_v43 = vld [vmem:[#allocation2 + $0xa8] sm:$0xff] }
 0x223   : > { %v3548_v27 = vpop.permute.xlu1 %3547  ;;  %v1861_v15 = vsel %vm1843_vm8, %v1828_v1, %v3065_v42  ;;  %v1860_v62 = vsel %vm1843_vm8, %v1827_v33, %v3064_v51  ;;  %v3543_v4 = vpop.permute.xlu0 %3542  ;;  %v3514_v42 = vunpack.i.l.bf16 %v4854_v2  ;;  %v3520_v51 = vunpack.i.h.bf16 %v4860_v5 }
 0x224   : > { %v3550_v52 = vunpack.i.h.bf16 %v3548_v27  ;;  %v3549_v48 = vunpack.i.l.bf16 %v3548_v27  ;;  %v1893_v28 = vsel %vm1876_vm9, %v1860_v62, %v3169_v7  ;;  %v1894_v56 = vsel %vm1876_vm9, %v1861_v15, %v3170_v24 }
 0x225   : > { %v3545_v58 = vunpack.i.h.bf16 %v3543_v4  ;;  %v3544_v26 = vunpack.i.l.bf16 %v3543_v4  ;;  %v1926_v17 = vsel %vm1909_vm10, %v1893_v28, %v3174_v11  ;;  %v1927_v47 = vsel %vm1909_vm10, %v1894_v56, %v3175_v63 }
 0x226   : > { %v3519_v24 = vunpack.i.l.bf16 %v4860_v5  ;;  %v1794_v11 = vsel %vm646_vm2, %v3719_v32, %v3550_v52  ;;  %v1793_v63 = vsel %vm646_vm2, %v3720_v43, %v3549_v48  ;;  %v1959_v2 = vsel %vm1942_vm11, %v1926_v17, %v3049_v41 }
 0x227   : > { %v2020_v1 = vsel %vm2008_vm13, %v1987_v0, %v3545_v58  ;;  %v2019_v7 = vsel %vm2008_vm13, %v1986_v55, %v3544_v26  ;;  %v3553_v60 = vpop.permute.xlu1 %3552  ;;  %v3558_v30 = vpop.permute.xlu0 %3557  ;;  %v1960_v15 = vsel %vm1942_vm11, %v1927_v47, %v3050_v39  ;;  %v3525_v52 = vunpack.i.h.bf16 %v4878_v16 }
 0x228   : > { %v2046_v33 = vpack.c.bf16 %v2020_v1, %v2019_v7  ;;  %v3555_v27 = vunpack.i.h.bf16 %v3553_v60  ;;  %v3554_v13 = vunpack.i.l.bf16 %v3553_v60  ;;  %v3560_v4 = vunpack.i.h.bf16 %v3558_v30 }
 0x229   : > { %v3559_v28 = vunpack.i.l.bf16 %v3558_v30  ;;  %v3524_v48 = vunpack.i.l.bf16 %v4878_v16  ;;  %v1992_v55 = vsel %vm1975_vm12, %v1959_v2, %v3109_v29  ;;  %v1993_v16 = vsel %vm1975_vm12, %v1960_v15, %v3110_v49 }
 0x22a   : > { %v1825_v5 = vsel %vm400_vm1, %v1793_v63, %v3554_v13  ;;  %v1826_v62 = vsel %vm400_vm1, %v1794_v11, %v3555_v27  ;;  %2941 = vmatmul.mubr.msk.bf16.gmra.mxu1 %vm2084_vm14, %v2046_v33  ;;  %v5311_v1 = vunpack.i.l.bf16 %v5304_v45  ;;  %v5312_v60 = vunpack.i.h.bf16 %v5304_v45 }
 0x22b   : > { %v1858_v56 = vsel %vm1843_vm8, %v1825_v5, %v3484_v9  ;;  %v1859_v57 = vsel %vm1843_vm8, %v1826_v62, %v3485_v8  ;;  %v4934_v41 = vpop.permute.xlu1 %3572  ;;  %v3563_v26 = vpop.permute.xlu0 %3562  ;;  %v5313_v30 = vunpack.i.l.bf16 %v5305_v10  ;;  %v5314_v11 = vunpack.i.h.bf16 %v5305_v10 }
 0x22c   : > { %v1891_v39 = vsel %vm1876_vm9, %v1858_v56, %v3509_v46  ;;  %v1892_v58 = vsel %vm1876_vm9, %v1859_v57, %v3510_v20  ;;  %v3565_v8 = vunpack.i.h.bf16 %v3563_v26  ;;  %v3564_v0 = vunpack.i.l.bf16 %v3563_v26 }
 0x22d   : > { %v1924_v9 = vsel %vm1909_vm10, %v1891_v39, %v3514_v42  ;;  %v1925_v50 = vsel %vm1909_vm10, %v1892_v58, %v3515_v36  ;;  %v1889_v46 = vsel %vm1876_vm9, %v4896_v54, %v3559_v28  ;;  %v1890_v20 = vsel %vm1876_vm9, %v1857_v25, %v3560_v4 }
 0x22e   : > { %v1957_v17 = vsel %vm1942_vm11, %v1924_v9, %v3059_v38  ;;  %v1958_v40 = vsel %vm1942_vm11, %v1925_v50, %v3060_v19  ;;  %v1922_v49 = vsel %vm1909_vm10, %v1889_v46, %v3564_v0  ;;  %v1923_v29 = vsel %vm1909_vm10, %v1890_v20, %v3565_v8  ;;  %v3721_v9 = vld [vmem:[#allocation2 + $0x158] sm:$0xff] }
 0x22f   : > { %v4957_v36 = vpop.permute.xlu1 %3587  ;;  %v1990_v54 = vsel %vm1975_vm12, %v1957_v17, %v3149_v31  ;;  %v1991_v25 = vsel %vm1975_vm12, %v1958_v40, %v3150_v22  ;;  %v5309_v38 = vunpack.i.l.bf16 %v4836_v14  ;;  %v5310_v19 = vunpack.i.h.bf16 %v4836_v14  ;;  %v3568_v42 = vpop.permute.xlu0 %3567 }
 0x230   : > { %v2025_v7 = vsel %vm2008_vm13, %v1992_v55, %v5311_v1  ;;  %v2026_v31 = vsel %vm2008_vm13, %v1993_v16, %v5312_v60  ;;  %v3570_v59 = vunpack.i.h.bf16 %v3568_v42  ;;  %v3569_v33 = vunpack.i.l.bf16 %v3568_v42 }
 0x231   : > { %v1955_v44 = vsel %vm1942_vm11, %v1922_v49, %v5309_v38  ;;  %v1956_v47 = vsel %vm1942_vm11, %v1923_v29, %v5310_v19  ;;  %v2023_v32 = vsel %vm2008_vm13, %v1990_v54, %v5313_v30  ;;  %v2024_v45 = vsel %vm2008_vm13, %v1991_v25, %v5314_v11  ;;  %v3723_v11 = vld [vmem:[#allocation2 + $0x170] sm:$0xff] }
 0x232   : > { %v1988_v22 = vsel %vm1975_vm12, %v1955_v44, %v3519_v24  ;;  %v1989_v27 = vsel %vm1975_vm12, %v1956_v47, %v3520_v51  ;;  %v2033_v43 = vsel %vm2008_vm13, %v4842_v35, %v3569_v33  ;;  %v2034_v24 = vsel %vm2008_vm13, %v4845_v3, %v3570_v59 }
 0x233   : > { %v2021_v13 = vsel %vm2008_vm13, %v1988_v22, %v3524_v48  ;;  %v2022_v14 = vsel %vm2008_vm13, %v1989_v27, %v3525_v52  ;;  %v4991_v63 = vpop.permute.xlu1 %3592  ;;  %v2053_v2 = vpack.c.bf16 %v2034_v24, %v2033_v43  ;;  %v3578_v15 = vpop.permute.xlu0 %3577  ;;  %v2048_v5 = vpack.c.bf16 %v2024_v45, %v2023_v32  ;;  %v3724_v43 = vld [vmem:[#allocation2 + $0x168] sm:$0xff] }
 0x234   : > { %v2047_v51 = vpack.c.bf16 %v2022_v14, %v2021_v13  ;;  %v2049_v62 = vpack.c.bf16 %v2026_v31, %v2025_v7  ;;  %v3505_v3 = vunpack.i.h.bf16 %v4832_v37  ;;  %v3504_v52 = vunpack.i.l.bf16 %v4832_v37 }
 0x235   : > { %v3575_v48 = vunpack.i.h.bf16 %v4934_v41  ;;  %v3574_v56 = vunpack.i.l.bf16 %v4934_v41  ;;  %v5315_v57 = vpack.c.bf16 %v4553_v23, %v4556_v21  ;;  %v5316_v39 = vpack.c.bf16 %v4629_v18, %v4626_v6  ;;  %v3722_v21 = vld [vmem:[#allocation2 + $0x150] sm:$0xff] }
 0x236   : > { %2944 = vmatprep.mubr.msk.bf16.mxu1 %vm2084_vm14, %v2047_v51  ;;  %v3580_v26 = vunpack.i.h.bf16 %v3578_v15  ;;  %v3579_v55 = vunpack.i.l.bf16 %v3578_v15  ;;  %v1969_v37 = vsel %vm1942_vm11, %v4815_v12, %v3504_v52  ;;  %v1970_v41 = vsel %vm1942_vm11, %v4818_v61, %v3505_v3 }
 0x237   : > { %2945 = vmatmul.mubr.msk.bf16.gmra.mxu1 %vm2084_vm14, %v2048_v5  ;;  %v4996_v10 = vpop.permute.xlu1 %3597  ;;  %v1808_v23 = vsel %vm646_vm2, %v3721_v9, %v3575_v48  ;;  %v1807_v50 = vsel %vm646_vm2, %v3722_v21, %v3574_v56  ;;  %v3590_v0 = vunpack.i.h.bf16 %v4957_v36  ;;  %v3589_v46 = vunpack.i.l.bf16 %v4957_v36 }
 0x238   : > { %2948 = vmatprep.mubr.msk.bf16.mxu1 %vm2084_vm14, %v2049_v62  ;;  %v3583_v4 = vpop.permute.xlu0 %3582  ;;  %v3595_v20 = vunpack.i.h.bf16 %v4991_v63  ;;  %v3594_v40 = vunpack.i.l.bf16 %v4991_v63  ;;  %v1840_v61 = vsel %vm400_vm1, %v1808_v23, %v3580_v26  ;;  %v1839_v49 = vsel %vm400_vm1, %v1807_v50, %v3579_v55 }
 0x239   : > { %v3584_v6 = vunpack.i.l.bf16 %v3583_v4  ;;  %v3585_v17 = vunpack.i.h.bf16 %v3583_v4  ;;  %v3600_v29 = vunpack.i.h.bf16 %v4996_v10  ;;  %v3599_v47 = vunpack.i.l.bf16 %v4996_v10 }
 0x23a   : > { %v5317_v7 = vpack.c.bf16 %v4800_v53, %v4803_v34 }
 0x23b   : > { %v4998_v35 = vpop.permute.xlu1 %3607  ;;  %v1872_v36 = vsel %vm1843_vm8, %v1839_v49, %v3584_v6  ;;  %v1873_v60 = vsel %vm1843_vm8, %v1840_v61, %v3585_v17 }
 0x23c   : > { %v5000_v28 = vpop.permute.xlu0 %3602  ;;  %v3610_v31 = vunpack.i.h.bf16 %v4998_v35  ;;  %v3609_v27 = vunpack.i.l.bf16 %v4998_v35 }
 0x23d   : > { %v3605_v53 = vunpack.i.h.bf16 %v5000_v28  ;;  %v3604_v34 = vunpack.i.l.bf16 %v5000_v28 }
 0x23f   : > { %2949 = vmatmul.mubr.msk.bf16.gmra.mxu1 %vm2084_vm14, %v5315_v57  ;;  %v3618_v58 = vpop.permute.xlu1 %3617 }
 0x240   : > { %2952 = vmatprep.mubr.msk.bf16.mxu1 %vm2084_vm14, %v5316_v39  ;;  %v5014_v16 = vpop.permute.xlu0 %3612  ;;  %v3620_v18 = vunpack.i.h.bf16 %v3618_v58  ;;  %v3619_v8 = vunpack.i.l.bf16 %v3618_v58 }
 0x241   : > { %v3615_v5 = vunpack.i.h.bf16 %v5014_v16  ;;  %v3614_v62 = vunpack.i.l.bf16 %v5014_v16 }
 0x242   : > { %v2002_v42 = vsel %vm1975_vm12, %v1969_v37, %v3619_v8  ;;  %v2003_v1 = vsel %vm1975_vm12, %v1970_v41, %v3620_v18 }
 0x243   : > { %v3628_v12 = vpop.permute.xlu1 %3627 }
 0x244   : > { %v3623_v54 = vpop.permute.xlu0 %3622  ;;  %v3630_v25 = vunpack.i.h.bf16 %v3628_v12  ;;  %v3629_v38 = vunpack.i.l.bf16 %v3628_v12 }
 0x245   : > { %v3625_v44 = vunpack.i.h.bf16 %v3623_v54  ;;  %v3624_v19 = vunpack.i.l.bf16 %v3623_v54 }
 0x246   : > { %v1810_v45 = vsel %vm646_vm2, %v3723_v11, %v3630_v25  ;;  %v1809_v24 = vsel %vm646_vm2, %v3724_v43, %v3629_v38 }
 0x247   : > { %2953 = vmatmul.mubr.msk.bf16.gmra.mxu1 %vm2084_vm14, %v5317_v7  ;;  %v2036_v59 = vsel %vm2008_vm13, %v2003_v1, %v3625_v44  ;;  %v2035_v33 = vsel %vm2008_vm13, %v2002_v42, %v3624_v19  ;;  %v3633_v22 = vpop.permute.xlu1 %3632 }
 0x248   : > { %2956 = vmatprep.mubr.msk.bf16.mxu1 %vm2084_vm14, %v2053_v2  ;;  %v2054_v13 = vpack.c.bf16 %v2036_v59, %v2035_v33  ;;  %v3635_v14 = vunpack.i.h.bf16 %v3633_v22  ;;  %v3634_v30 = vunpack.i.l.bf16 %v3633_v22  ;;  %v3643_v32 = vpop.permute.xlu0 %3642 }
 0x249   : > { %v3645_v2 = vunpack.i.h.bf16 %v3643_v32  ;;  %v3644_v15 = vunpack.i.l.bf16 %v3643_v32 }
 0x24a   : > { %v1841_v63 = vsel %vm400_vm1, %v1809_v24, %v3634_v30  ;;  %v1842_v51 = vsel %vm400_vm1, %v1810_v45, %v3635_v14 }
 0x24b   : > { %v1874_v10 = vsel %vm1843_vm8, %v1841_v63, %v3589_v46  ;;  %v1875_v4 = vsel %vm1843_vm8, %v1842_v51, %v3590_v0  ;;  %v3638_v35 = vpop.permute.xlu1 %3637  ;;  %v1905_v55 = vsel %vm1876_vm9, %v1872_v36, %v3644_v15  ;;  %v1906_v16 = vsel %vm1876_vm9, %v1873_v60, %v3645_v2 }
 0x24c   : > { %v1907_v28 = vsel %vm1876_vm9, %v1874_v10, %v3594_v40  ;;  %v1908_v3 = vsel %vm1876_vm9, %v1875_v4, %v3595_v20  ;;  %v3640_v52 = vunpack.i.h.bf16 %v3638_v35  ;;  %v3639_v48 = vunpack.i.l.bf16 %v3638_v35  ;;  %v3648_v56 = vpop.permute.xlu0 %3647 }
 0x24d   : > { %v1940_v57 = vsel %vm1909_vm10, %v1907_v28, %v3599_v47  ;;  %v1941_v39 = vsel %vm1909_vm10, %v1908_v3, %v3600_v29  ;;  %v3650_v58 = vunpack.i.h.bf16 %v3648_v56  ;;  %v3649_v26 = vunpack.i.l.bf16 %v3648_v56  ;;  %v5079_v47 = vld [vmem:[%s5260_s5] ss:$0 sm:$0xff] }
 0x24e   : > { %v1973_v37 = vsel %vm1942_vm11, %v1940_v57, %v3609_v27  ;;  %v1974_v41 = vsel %vm1942_vm11, %v1941_v39, %v3610_v31 }
 0x24f   : > { %2957 = vmatmul.mubr.msk.bf16.gmra.mxu1 %vm2084_vm14, %v2054_v13  ;;  %v2006_v9 = vsel %vm1975_vm12, %v1973_v37, %v3639_v48  ;;  %v2007_v23 = vsel %vm1975_vm12, %v1974_v41, %v3640_v52  ;;  %v1938_v21 = vsel %vm1909_vm10, %v1905_v55, %v3649_v26  ;;  %v1939_v50 = vsel %vm1909_vm10, %v1906_v16, %v3650_v58  ;;  %v3658_v6 = vpop.permute.xlu1 %3657 }
 0x250   : > { %v1971_v18 = vsel %vm1942_vm11, %v1938_v21, %v3604_v34  ;;  %v1972_v8 = vsel %vm1942_vm11, %v1939_v50, %v3605_v53  ;;  %v3660_v0 = vunpack.i.h.bf16 %v3658_v6  ;;  %v3659_v46 = vunpack.i.l.bf16 %v3658_v6  ;;  %v3653_v20 = vpop.permute.xlu0 %3652 }
 0x251   : > { %v3655_v17 = vunpack.i.h.bf16 %v3653_v20  ;;  %v3654_v12 = vunpack.i.l.bf16 %v3653_v20  ;;  %v2004_v40 = vsel %vm1975_vm12, %v1971_v18, %v3614_v62  ;;  %v2005_v61 = vsel %vm1975_vm12, %v1972_v8, %v3615_v5 }
 0x252   : > { %v2039_v49 = vsel %vm2008_vm13, %v2006_v9, %v3659_v46  ;;  %v2040_v29 = vsel %vm2008_vm13, %v2007_v23, %v3660_v0 }
 0x253   : > { %v2056_v54 = vpack.c.bf16 %v2040_v29, %v2039_v49  ;;  %v2037_v25 = vsel %vm2008_vm13, %v2004_v40, %v3654_v12  ;;  %v2038_v38 = vsel %vm2008_vm13, %v2005_v61, %v3655_v17  ;;  %v2349_v53 = vpop.permute.xlu1 %2348 }
 0x254   : > { %v2055_v44 = vpack.c.bf16 %v2038_v38, %v2037_v25  ;;  %v2347_v30 = vpop.permute.xlu0 %2346 }
 0x256   : > { %2960 = vmatprep.mubr.msk.bf16.mxu1 %vm2084_vm14, %v2055_v44 }
 0x257   : > { %2961 = vmatmul.mubr.msk.bf16.gmra.mxu1 %vm2084_vm14, %v2056_v54  ;;  %v2353_v48 = vpop.permute.xlu1 %2352 }
 0x258   : > { %v2351_v3 = vpop.permute.xlu0 %2350 }
 0x25b   : > { %v2357_v46 = vpop.permute.xlu1 %2356 }
 0x25c   : > { %v2355_v8 = vpop.permute.xlu0 %2354 }
 0x285   : > { %v2934_v19 = vpop.f32.mrf.mxu1 }
 0x286   : > { %v2180_v42 = vadd.f32 %v2934_v19, %v5079_v47 }
 0x287   : > { %v2171_v36 = vpop.f32.mrf.mxu1 }
 0x288   : > { %v2172_v7 = vadd.f32 %v5079_v47, %v2171_v36  ;;  %v2300_v22 = vmax.f32 %v2180_v42, 0.0 }
 0x289   : > { %v2935_v1 = vpop.f32.mrf.mxu1 }
 0x28a   : > { %v2183_v60 = vadd.f32 %v2935_v1, %v5079_v47  ;;  %v2298_v27 = vmax.f32 %v2172_v7, 0.0 }
 0x28b   : > { %v2174_v31 = vpop.f32.mrf.mxu1 }
 0x28c   : > { %v2301_v59 = vmax.f32 %v2183_v60, 0.0  ;;  %v2175_v33 = vadd.f32 %v5079_v47, %v2174_v31  ;;  %v2359_v31 = vpop.permute.xlu0 %2358 }
 0x28e   : > { %v2299_v13 = vmax.f32 %v2175_v33, 0.0  ;;  %v2331_v14 = vpack.c.bf16 %v2301_v59, %v2300_v22  ;;  %v2361_v33 = vpop.permute.xlu1 %2360 }
 0x290   : > { %v2330_v32 = vpack.c.bf16 %v2299_v13, %v2298_v27  ;;  %v2383_v11 = vsel %vm646_vm2, %v2331_v14, %v2349_v53 }
 0x292   : > { %v2380_v34 = vsel %vm646_vm2, %v2330_v32, %v2347_v30 }
 0x293   : > { %2966 = vmatprep.mubr.msk.bf16.mxu0 %vm1843_vm8, %v2380_v34 }
 0x294   : > { %2967 = vmatmul.mubr.msk.bf16.vlgmr.msra.gmra.mxu0 %vm1843_vm8, %v2383_v11 }
 0x2bd   : > { %v2938_v45 = vpop.f32.mrf.mxu1 }
 0x2be   : > { %v2196_v24 = vadd.f32 %v2938_v45, %v5079_v47 }
 0x2bf   : > { %v2187_v43 = vpop.f32.mrf.mxu1 }
 0x2c0   : > { %v2188_v51 = vadd.f32 %v5079_v47, %v2187_v43  ;;  %v2304_v10 = vmax.f32 %v2196_v24, 0.0 }
 0x2c1   : > { %v2939_v63 = vpop.f32.mrf.mxu1 }
 0x2c2   : > { %v2199_v2 = vadd.f32 %v2939_v63, %v5079_v47  ;;  %v2302_v4 = vmax.f32 %v2188_v51, 0.0 }
 0x2c3   : > { %v2190_v15 = vpop.f32.mrf.mxu1 }
 0x2c4   : > { %v2305_v5 = vmax.f32 %v2199_v2, 0.0  ;;  %v2191_v62 = vadd.f32 %v5079_v47, %v2190_v15  ;;  %v2363_v15 = vpop.permute.xlu0 %2362 }
 0x2c6   : > { %v2303_v35 = vmax.f32 %v2191_v62, 0.0  ;;  %v2333_v28 = vpack.c.bf16 %v2305_v5, %v2304_v10  ;;  %v2365_v62 = vpop.permute.xlu1 %2364 }
 0x2c8   : > { %v2332_v52 = vpack.c.bf16 %v2303_v35, %v2302_v4  ;;  %v2389_v57 = vsel %vm646_vm2, %v2333_v28, %v2353_v48 }
 0x2ca   : > { %v2386_v56 = vsel %vm646_vm2, %v2332_v52, %v2351_v3 }
 0x2cb   : > { %2970 = vmatprep.mubr.msk.bf16.mxu0 %vm1843_vm8, %v2386_v56 }
 0x2cc   : > { %2971 = vmatmul.mubr.msk.bf16.gmra.mxu0 %vm1843_vm8, %v2389_v57 }
 0x2ea   : > { %v2942_v39 = vpop.f32.mrf.mxu1 }
 0x2eb   : > { %v2212_v26 = vadd.f32 %v2942_v39, %v5079_v47 }
 0x2ec   : > { %v2203_v58 = vpop.f32.mrf.mxu1 }
 0x2ed   : > { %v2204_v16 = vadd.f32 %v5079_v47, %v2203_v58  ;;  %v2308_v21 = vmax.f32 %v2212_v26, 0.0 }
 0x2ee   : > { %v2943_v55 = vpop.f32.mrf.mxu1 }
 0x2ef   : > { %v2215_v37 = vadd.f32 %v2943_v55, %v5079_v47  ;;  %v2306_v50 = vmax.f32 %v2204_v16, 0.0 }
 0x2f0   : > { %v2206_v41 = vpop.f32.mrf.mxu1 }
 0x2f1   : > { %v2309_v9 = vmax.f32 %v2215_v37, 0.0  ;;  %v2207_v23 = vadd.f32 %v5079_v47, %v2206_v41  ;;  %v2367_v41 = vpop.permute.xlu0 %2366 }
 0x2f3   : > { %v2307_v6 = vmax.f32 %v2207_v23, 0.0  ;;  %v2335_v18 = vpack.c.bf16 %v2309_v9, %v2308_v21  ;;  %v2369_v23 = vpop.permute.xlu1 %2368 }
 0x2f5   : > { %v2334_v0 = vpack.c.bf16 %v2307_v6, %v2306_v50  ;;  %v2395_v12 = vsel %vm646_vm2, %v2335_v18, %v2357_v46 }
 0x2f7   : > { %v2946_v20 = vpop.f32.mrf.mxu1  ;;  %v2392_v17 = vsel %vm646_vm2, %v2334_v0, %v2355_v8 }
 0x2f8   : > { %2974 = vmatprep.mubr.msk.bf16.mxu0 %vm1843_vm8, %v2392_v17  ;;  %v2228_v61 = vadd.f32 %v2946_v20, %v5079_v47 }
 0x2f9   : > { %v2219_v40 = vpop.f32.mrf.mxu1  ;;  %2975 = vmatmul.mubr.msk.bf16.gmra.mxu0 %vm1843_vm8, %v2395_v12 }
 0x2fa   : > { %v2220_v29 = vadd.f32 %v5079_v47, %v2219_v40  ;;  %v2312_v19 = vmax.f32 %v2228_v61, 0.0 }
 0x2fb   : > { %v2947_v49 = vpop.f32.mrf.mxu1 }
 0x2fc   : > { %v2231_v54 = vadd.f32 %v2947_v49, %v5079_v47  ;;  %v2310_v42 = vmax.f32 %v2220_v29, 0.0 }
 0x2fd   : > { %v2222_v25 = vpop.f32.mrf.mxu1 }
 0x2fe   : > { %v2313_v38 = vmax.f32 %v2231_v54, 0.0  ;;  %v2223_v44 = vadd.f32 %v5079_v47, %v2222_v25  ;;  %v2371_v54 = vpop.permute.xlu0 %2370 }
 0x2ff   : > { %v2950_v36 = vpop.f32.mrf.mxu1 }
 0x300   : > { %v2311_v1 = vmax.f32 %v2223_v44, 0.0  ;;  %v2337_v7 = vpack.c.bf16 %v2313_v38, %v2312_v19  ;;  %v2244_v22 = vadd.f32 %v2950_v36, %v5079_v47  ;;  %v2373_v38 = vpop.permute.xlu1 %2372 }
 0x301   : > { %v2235_v60 = vpop.f32.mrf.mxu1 }
 0x302   : > { %v2336_v59 = vpack.c.bf16 %v2311_v1, %v2310_v42  ;;  %v2236_v13 = vadd.f32 %v5079_v47, %v2235_v60  ;;  %v2401_v32 = vsel %vm646_vm2, %v2337_v7, %v2361_v33  ;;  %v2316_v45 = vmax.f32 %v2244_v22, 0.0 }
 0x303   : > { %v2951_v27 = vpop.f32.mrf.mxu1 }
 0x304   : > { %v2398_v14 = vsel %vm646_vm2, %v2336_v59, %v2359_v31  ;;  %v2247_v30 = vadd.f32 %v2951_v27, %v5079_v47  ;;  %v2314_v24 = vmax.f32 %v2236_v13, 0.0 }
 0x305   : > { %v2238_v53 = vpop.f32.mrf.mxu1  ;;  %2978 = vmatprep.mubr.msk.bf16.mxu0 %vm1843_vm8, %v2398_v14 }
 0x306   : > { %v2317_v34 = vmax.f32 %v2247_v30, 0.0  ;;  %v2239_v11 = vadd.f32 %v5079_v47, %v2238_v53  ;;  %2979 = vmatmul.mubr.msk.bf16.gmra.mxu0 %vm1843_vm8, %v2401_v32  ;;  %v2375_v30 = vpop.permute.xlu0 %2374  ;;  %v2377_v53 = vpop.permute.xlu1 %2376 }
 0x307   : > { %v2954_v43 = vpop.f32.mrf.mxu1 }
 0x308   : > { %v2315_v63 = vmax.f32 %v2239_v11, 0.0  ;;  %v2339_v51 = vpack.c.bf16 %v2317_v34, %v2316_v45  ;;  %v2260_v10 = vadd.f32 %v2954_v43, %v5079_v47  ;;  %v5148_v45 = vld [vmem:[%s5261_s6] ss:$0 sm:$0xff] }
 0x309   : > { %v2251_v2 = vpop.f32.mrf.mxu1 }
 0x30a   : > { %v2338_v5 = vpack.c.bf16 %v2315_v63, %v2314_v24  ;;  %v2252_v35 = vadd.f32 %v5079_v47, %v2251_v2  ;;  %v2407_v52 = vsel %vm646_vm2, %v2339_v51, %v2365_v62  ;;  %v2320_v39 = vmax.f32 %v2260_v10, 0.0 }
 0x30b   : > { %v2955_v4 = vpop.f32.mrf.mxu1 }
 0x30c   : > { %v2404_v28 = vsel %vm646_vm2, %v2338_v5, %v2363_v15  ;;  %v2263_v3 = vadd.f32 %v2955_v4, %v5079_v47  ;;  %v2318_v26 = vmax.f32 %v2252_v35, 0.0 }
 0x30d   : > { %v2254_v48 = vpop.f32.mrf.mxu1  ;;  %2982 = vmatprep.mubr.msk.bf16.mxu0 %vm1843_vm8, %v2404_v28 }
 0x30e   : > { %v2321_v56 = vmax.f32 %v2263_v3, 0.0  ;;  %v2255_v57 = vadd.f32 %v5079_v47, %v2254_v48  ;;  %2983 = vmatmul.mubr.msk.bf16.gmra.mxu0 %vm1843_vm8, %v2407_v52 }
 0x30f   : > { %v2958_v58 = vpop.f32.mrf.mxu1 }
 0x310   : > { %v2319_v55 = vmax.f32 %v2255_v57, 0.0  ;;  %v2341_v16 = vpack.c.bf16 %v2321_v56, %v2320_v39  ;;  %v2276_v21 = vadd.f32 %v2958_v58, %v5079_v47 }
 0x311   : > { %v2267_v37 = vpop.f32.mrf.mxu1 }
 0x312   : > { %v2340_v9 = vpack.c.bf16 %v2319_v55, %v2318_v26  ;;  %v2268_v6 = vadd.f32 %v5079_v47, %v2267_v37  ;;  %v2413_v0 = vsel %vm646_vm2, %v2341_v16, %v2369_v23  ;;  %v2324_v12 = vmax.f32 %v2276_v21, 0.0 }
 0x313   : > { %v2959_v50 = vpop.f32.mrf.mxu1 }
 0x314   : > { %v2410_v18 = vsel %vm646_vm2, %v2340_v9, %v2367_v41  ;;  %v2279_v8 = vadd.f32 %v2959_v50, %v5079_v47  ;;  %v2322_v40 = vmax.f32 %v2268_v6, 0.0 }
 0x315   : > { %v2270_v46 = vpop.f32.mrf.mxu1  ;;  %2986 = vmatprep.mubr.msk.bf16.mxu0 %vm1843_vm8, %v2410_v18 }
 0x316   : > { %v2325_v20 = vmax.f32 %v2279_v8, 0.0  ;;  %v2271_v17 = vadd.f32 %v5079_v47, %v2270_v46  ;;  %2987 = vmatmul.mubr.msk.bf16.gmra.mxu0 %vm1843_vm8, %v2413_v0 }
 0x317   : > { %v2962_v49 = vpop.f32.mrf.mxu1 }
 0x318   : > { %v2323_v61 = vmax.f32 %v2271_v17, 0.0  ;;  %v2343_v29 = vpack.c.bf16 %v2325_v20, %v2324_v12  ;;  %v2292_v19 = vadd.f32 %v2962_v49, %v5079_v47 }
 0x319   : > { %v2283_v44 = vpop.f32.mrf.mxu1 }
 0x31a   : > { %v2342_v25 = vpack.c.bf16 %v2323_v61, %v2322_v40  ;;  %v2419_v1 = vsel %vm646_vm2, %v2343_v29, %v2373_v38  ;;  %v2284_v7 = vadd.f32 %v5079_v47, %v2283_v44  ;;  %v2328_v22 = vmax.f32 %v2292_v19, 0.0 }
 0x31b   : > { %v2963_v42 = vpop.f32.mrf.mxu1 }
 0x31c   : > { %v2416_v36 = vsel %vm646_vm2, %v2342_v25, %v2371_v54  ;;  %v2295_v60 = vadd.f32 %v2963_v42, %v5079_v47  ;;  %v2326_v27 = vmax.f32 %v2284_v7, 0.0 }
 0x31d   : > { %2990 = vmatprep.mubr.msk.bf16.mxu0 %vm1843_vm8, %v2416_v36  ;;  %v2286_v31 = vpop.f32.mrf.mxu1 }
 0x31e   : > { %2991 = vmatmul.mubr.msk.bf16.gmra.mxu0 %vm1843_vm8, %v2419_v1  ;;  %v2329_v59 = vmax.f32 %v2295_v60, 0.0  ;;  %v2287_v33 = vadd.f32 %v5079_v47, %v2286_v31 }
 0x320   : > { %v2327_v13 = vmax.f32 %v2287_v33, 0.0  ;;  %v2345_v14 = vpack.c.bf16 %v2329_v59, %v2328_v22 }
 0x322   : > { %v2344_v32 = vpack.c.bf16 %v2327_v13, %v2326_v27  ;;  %v2425_v11 = vsel %vm646_vm2, %v2345_v14, %v2377_v53 }
 0x324   : > { %v2422_v34 = vsel %vm646_vm2, %v2344_v32, %v2375_v30 }
 0x325   : > { %2994 = vmatprep.mubr.msk.bf16.mxu0 %vm1843_vm8, %v2422_v34 }
 0x326   : > { %2995 = vmatmul.mubr.msk.bf16.gmra.mxu0 %vm1843_vm8, %v2425_v11 }
 0x354   : > { %v2968_v47 = vpop.f32.mrf.mxu0 }
 0x355   : > { %v2518_v43 = vadd.f32 %v2968_v47, %v5148_v45 }
 0x356   : > { %v2509_v24 = vpop.f32.mrf.mxu0 }
 0x357   : > { %v2638_v63 = vmax.f32 %v2518_v43, 0.0  ;;  %v2510_v51 = vadd.f32 %v5148_v45, %v2509_v24 }
 0x358   : > { %v2969_v2 = vpop.f32.mrf.mxu0 }
 0x359   : > { %2670 = vst.msk [vmem:[%s5155_s13 + $0x10] sm:$0xff] %vm400_vm1, %v2638_v63  ;;  %v2636_v15 = vmax.f32 %v2510_v51, 0.0  ;;  %v2521_v5 = vadd.f32 %v2969_v2, %v5148_v45 }
 0x35a   : > { %v2512_v62 = vpop.f32.mrf.mxu0 }
 0x35b   : > { %2668 = vst.msk [vmem:[%s5155_s13] sm:$0xff] %vm400_vm1, %v2636_v15  ;;  %v2639_v10 = vmax.f32 %v2521_v5, 0.0  ;;  %v2513_v4 = vadd.f32 %v5148_v45, %v2512_v62 }
 0x35d   : > { %2671 = vst.msk [vmem:[%s5155_s13 + $0x18] sm:$0xff] %vm400_vm1, %v2639_v10  ;;  %v2637_v35 = vmax.f32 %v2513_v4, 0.0 }
 0x35f   : > { %2669 = vst.msk [vmem:[%s5155_s13 + $0x8] sm:$0xff] %vm400_vm1, %v2637_v35 }
 0x38c   : > { %v2972_v28 = vpop.f32.mrf.mxu0 }
 0x38d   : > { %v2534_v3 = vadd.f32 %v2972_v28, %v5148_v45 }
 0x38e   : > { %v2525_v52 = vpop.f32.mrf.mxu0 }
 0x38f   : > { %v2642_v48 = vmax.f32 %v2534_v3, 0.0  ;;  %v2526_v56 = vadd.f32 %v5148_v45, %v2525_v52 }
 0x390   : > { %v2973_v57 = vpop.f32.mrf.mxu0 }
 0x391   : > { %2674 = vst.msk [vmem:[%s5155_s13 + $0x30] sm:$0xff] %vm400_vm1, %v2642_v48  ;;  %v2640_v39 = vmax.f32 %v2526_v56, 0.0  ;;  %v2537_v58 = vadd.f32 %v2973_v57, %v5148_v45 }
 0x392   : > { %v2528_v26 = vpop.f32.mrf.mxu0 }
 0x393   : > { %2672 = vst.msk [vmem:[%s5155_s13 + $0x20] sm:$0xff] %vm400_vm1, %v2640_v39  ;;  %v2643_v55 = vmax.f32 %v2537_v58, 0.0  ;;  %v2529_v16 = vadd.f32 %v5148_v45, %v2528_v26 }
 0x395   : > { %2675 = vst.msk [vmem:[%s5155_s13 + $0x38] sm:$0xff] %vm400_vm1, %v2643_v55  ;;  %v2641_v37 = vmax.f32 %v2529_v16, 0.0 }
 0x397   : > { %2673 = vst.msk [vmem:[%s5155_s13 + $0x28] sm:$0xff] %vm400_vm1, %v2641_v37 }
 0x3b9   : > { %v2976_v41 = vpop.f32.mrf.mxu0 }
 0x3ba   : > { %v2550_v9 = vadd.f32 %v2976_v41, %v5148_v45 }
 0x3bb   : > { %v2541_v23 = vpop.f32.mrf.mxu0 }
 0x3bc   : > { %v2646_v21 = vmax.f32 %v2550_v9, 0.0  ;;  %v2542_v50 = vadd.f32 %v5148_v45, %v2541_v23 }
 0x3bd   : > { %v2977_v6 = vpop.f32.mrf.mxu0 }
 0x3be   : > { %2678 = vst.msk [vmem:[%s5155_s13 + $0x50] sm:$0xff] %vm400_vm1, %v2646_v21  ;;  %v2644_v18 = vmax.f32 %v2542_v50, 0.0  ;;  %v2553_v8 = vadd.f32 %v2977_v6, %v5148_v45 }
 0x3bf   : > { %v2544_v0 = vpop.f32.mrf.mxu0 }
 0x3c0   : > { %2676 = vst.msk [vmem:[%s5155_s13 + $0x40] sm:$0xff] %vm400_vm1, %v2644_v18  ;;  %v2647_v46 = vmax.f32 %v2553_v8, 0.0  ;;  %v2545_v20 = vadd.f32 %v5148_v45, %v2544_v0 }
 0x3c2   : > { %2679 = vst.msk [vmem:[%s5155_s13 + $0x58] sm:$0xff] %vm400_vm1, %v2647_v46  ;;  %v2645_v17 = vmax.f32 %v2545_v20, 0.0 }
 0x3c4   : > { %2677 = vst.msk [vmem:[%s5155_s13 + $0x48] sm:$0xff] %vm400_vm1, %v2645_v17 }
 0x3c6   : > { %v2980_v12 = vpop.f32.mrf.mxu0 }
 0x3c7   : > { %v2566_v40 = vadd.f32 %v2980_v12, %v5148_v45 }
 0x3c8   : > { %v2557_v61 = vpop.f32.mrf.mxu0 }
 0x3c9   : > { %v2650_v49 = vmax.f32 %v2566_v40, 0.0  ;;  %v2558_v29 = vadd.f32 %v5148_v45, %v2557_v61 }
 0x3ca   : > { %v2981_v54 = vpop.f32.mrf.mxu0 }
 0x3cb   : > { %2682 = vst.msk [vmem:[%s5155_s13 + $0x70] sm:$0xff] %vm400_vm1, %v2650_v49  ;;  %v2648_v25 = vmax.f32 %v2558_v29, 0.0  ;;  %v2569_v38 = vadd.f32 %v2981_v54, %v5148_v45 }
 0x3cc   : > { %v2560_v44 = vpop.f32.mrf.mxu0 }
 0x3cd   : > { %2680 = vst.msk [vmem:[%s5155_s13 + $0x60] sm:$0xff] %vm400_vm1, %v2648_v25  ;;  %v2651_v19 = vmax.f32 %v2569_v38, 0.0  ;;  %v2561_v36 = vadd.f32 %v5148_v45, %v2560_v44 }
 0x3ce   : > { %v2984_v42 = vpop.f32.mrf.mxu0 }
 0x3cf   : > { %2683 = vst.msk [vmem:[%s5155_s13 + $0x78] sm:$0xff] %vm400_vm1, %v2651_v19  ;;  %v2649_v1 = vmax.f32 %v2561_v36, 0.0  ;;  %v2582_v7 = vadd.f32 %v2984_v42, %v5148_v45 }
 0x3d0   : > { %v2573_v60 = vpop.f32.mrf.mxu0 }
 0x3d1   : > { %2681 = vst.msk [vmem:[%s5155_s13 + $0x68] sm:$0xff] %vm400_vm1, %v2649_v1  ;;  %v2654_v31 = vmax.f32 %v2582_v7, 0.0  ;;  %v2574_v59 = vadd.f32 %v5148_v45, %v2573_v60 }
 0x3d2   : > { %v2985_v33 = vpop.f32.mrf.mxu0 }
 0x3d3   : > { %2686 = vst.msk [vmem:[%s5155_s13 + $0x90] sm:$0xff] %vm400_vm1, %v2654_v31  ;;  %v2652_v22 = vmax.f32 %v2574_v59, 0.0  ;;  %v2585_v27 = vadd.f32 %v2985_v33, %v5148_v45 }
 0x3d4   : > { %v2576_v13 = vpop.f32.mrf.mxu0 }
 0x3d5   : > { %2684 = vst.msk [vmem:[%s5155_s13 + $0x80] sm:$0xff] %vm400_vm1, %v2652_v22  ;;  %v2655_v14 = vmax.f32 %v2585_v27, 0.0  ;;  %v2577_v30 = vadd.f32 %v5148_v45, %v2576_v13 }
 0x3d6   : > { %v2988_v32 = vpop.f32.mrf.mxu0 }
 0x3d7   : > { %2687 = vst.msk [vmem:[%s5155_s13 + $0x98] sm:$0xff] %vm400_vm1, %v2655_v14  ;;  %v2653_v53 = vmax.f32 %v2577_v30, 0.0  ;;  %v2598_v34 = vadd.f32 %v2988_v32, %v5148_v45 }
 0x3d8   : > { %v2589_v11 = vpop.f32.mrf.mxu0 }
 0x3d9   : > { %2685 = vst.msk [vmem:[%s5155_s13 + $0x88] sm:$0xff] %vm400_vm1, %v2653_v53  ;;  %v2658_v47 = vmax.f32 %v2598_v34, 0.0  ;;  %v2590_v43 = vadd.f32 %v5148_v45, %v2589_v11 }
 0x3da   : > { %v2989_v24 = vpop.f32.mrf.mxu0 }
 0x3db   : > { %2690 = vst.msk [vmem:[%s5155_s13 + $0xb0] sm:$0xff] %vm400_vm1, %v2658_v47  ;;  %v2656_v63 = vmax.f32 %v2590_v43, 0.0  ;;  %v2601_v51 = vadd.f32 %v2989_v24, %v5148_v45 }
 0x3dc   : > { %v2592_v2 = vpop.f32.mrf.mxu0 }
 0x3dd   : > { %2688 = vst.msk [vmem:[%s5155_s13 + $0xa0] sm:$0xff] %vm400_vm1, %v2656_v63  ;;  %v2659_v15 = vmax.f32 %v2601_v51, 0.0  ;;  %v2593_v5 = vadd.f32 %v5148_v45, %v2592_v2 }
 0x3de   : > { %v2992_v62 = vpop.f32.mrf.mxu0 }
 0x3df   : > { %2691 = vst.msk [vmem:[%s5155_s13 + $0xb8] sm:$0xff] %vm400_vm1, %v2659_v15  ;;  %v2657_v10 = vmax.f32 %v2593_v5, 0.0  ;;  %v2614_v4 = vadd.f32 %v2992_v62, %v5148_v45 }
 0x3e0   : > { %v2605_v35 = vpop.f32.mrf.mxu0 }
 0x3e1   : > { %2689 = vst.msk [vmem:[%s5155_s13 + $0xa8] sm:$0xff] %vm400_vm1, %v2657_v10  ;;  %v2662_v28 = vmax.f32 %v2614_v4, 0.0  ;;  %v2606_v3 = vadd.f32 %v5148_v45, %v2605_v35 }
 0x3e2   : > { %v2993_v52 = vpop.f32.mrf.mxu0 }
 0x3e3   : > { %2694 = vst.msk [vmem:[%s5155_s13 + $0xd0] sm:$0xff] %vm400_vm1, %v2662_v28  ;;  %v2660_v48 = vmax.f32 %v2606_v3, 0.0  ;;  %v2617_v56 = vadd.f32 %v2993_v52, %v5148_v45 }
 0x3e4   : > { %v2608_v57 = vpop.f32.mrf.mxu0 }
 0x3e5   : > { %2692 = vst.msk [vmem:[%s5155_s13 + $0xc0] sm:$0xff] %vm400_vm1, %v2660_v48  ;;  %v2663_v39 = vmax.f32 %v2617_v56, 0.0  ;;  %v2609_v58 = vadd.f32 %v5148_v45, %v2608_v57 }
 0x3e6   : > { %v2996_v55 = vpop.f32.mrf.mxu0 }
 0x3e7   : > { %2695 = vst.msk [vmem:[%s5155_s13 + $0xd8] sm:$0xff] %vm400_vm1, %v2663_v39  ;;  %v2661_v26 = vmax.f32 %v2609_v58, 0.0  ;;  %v2630_v16 = vadd.f32 %v2996_v55, %v5148_v45 }
 0x3e8   : > { %v2621_v37 = vpop.f32.mrf.mxu0 }
 0x3e9   : > { %2693 = vst.msk [vmem:[%s5155_s13 + $0xc8] sm:$0xff] %vm400_vm1, %v2661_v26  ;;  %v2666_v41 = vmax.f32 %v2630_v16, 0.0  ;;  %v2622_v9 = vadd.f32 %v5148_v45, %v2621_v37 }
 0x3ea   : > { %v2997_v23 = vpop.f32.mrf.mxu0 }
 0x3eb   : > { %2698 = vst.msk [vmem:[%s5155_s13 + $0xf0] sm:$0xff] %vm400_vm1, %v2666_v41  ;;  %v2664_v21 = vmax.f32 %v2622_v9, 0.0  ;;  %v2633_v50 = vadd.f32 %v2997_v23, %v5148_v45 }
 0x3ec   : > { %v2624_v6 = vpop.f32.mrf.mxu0 }
 0x3ed   : > { %2696 = vst.msk [vmem:[%s5155_s13 + $0xe0] sm:$0xff] %vm400_vm1, %v2664_v21  ;;  %v2667_v18 = vmax.f32 %v2633_v50, 0.0  ;;  %v2625_v8 = vadd.f32 %v5148_v45, %v2624_v6 }
 0x3ef   : > { %2699 = vst.msk [vmem:[%s5155_s13 + $0xf8] sm:$0xff] %vm400_vm1, %v2667_v18  ;;  %v2665_v0 = vmax.f32 %v2625_v8, 0.0 }
 0x3f1   : > { %2697 = vst.msk [vmem:[%s5155_s13 + $0xe8] sm:$0xff] %vm400_vm1, %v2665_v0 }
 0x3f2 PF: > { %s17_s24 = sadd.s32 1, %s3731_s24  }
 0x3f3   : > { %p14_p4 = scmp.ge.s32.totalorder %s17_s24, 4  }
 0x3f5   :  { %16 = sbr.rel (!%p14_p4) target bundleno = 1 (0x1), region = 80 }

</bundles_post_ra>
